<compile_context>
chip_gen: v7x
topology: tpu7x:2x2x1
jax: 0.10.0
libtpu: 0.0.40
codegen_flags: <defaults>
</compile_context>

<pallas_src>
import functools
import math

import jax
import jax.numpy as jnp
import numpy as np
from jax.experimental import pallas as pl
from jax.experimental.pallas import tpu as pltpu


def _round_up(x, m):
    return ((x + m - 1) // m) * m


def vbow_kernel(ids_ref, eps_ref, w_in_ref, w_mulv_ref, w_out_ref, obias_ref,
                logits_ref, mulv_ref):
    ids = ids_ref[...]                                   # (bt, L) int32 token ids
    bt, seq_len = ids.shape
    v_pad = w_in_ref.shape[0]
    k = eps_ref.shape[1]

    # --- encode: bag-of-words as a one-hot-counts matmul on the MXU ---------
    # counts[:, v_pad-1] == 1 always: that row of W_in_aug carries input_bias
    # and the "ones" marker column used to apply b_mu/b_lv in the next matmul.
    lane_v = jax.lax.broadcasted_iota(jnp.int32, (bt, v_pad), 1)
    counts = (lane_v == (v_pad - 1)).astype(jnp.float32)
    for l in range(seq_len):                             # static, small L
        counts = counts + (lane_v == ids[:, l:l + 1]).astype(jnp.float32)
    # Token id 0 (padding) hits the zeroed row 0 of W_in_aug -> (x > 0) mask.

    h = jnp.dot(counts.astype(w_in_ref.dtype), w_in_ref[...],
                preferred_element_type=jnp.float32)      # (bt, E_pad) = bow + input_bias
    h = jnp.maximum(h, 0.0)                              # ReLU (ones column stays 1)

    # --- fused mu | logvar projection (biases folded via the ones column) ---
    mulv = jnp.dot(h.astype(w_mulv_ref.dtype), w_mulv_ref[...],
                   preferred_element_type=jnp.float32)   # (bt, MULV_pad)
    mulv_ref[...] = mulv                                 # lane-dense 128-wide store
    mu = mulv_ref[:, :k]
    logvar = mulv_ref[:, k:2 * k]

    # --- reparameterization (f32 elementwise) + decode -----------------------
    z = eps_ref[...] * jnp.exp(0.5 * logvar) + mu        # (bt, K) f32
    logits = jnp.dot(z.astype(w_out_ref.dtype), w_out_ref[...],
                     preferred_element_type=jnp.float32) + obias_ref[...]
    logits_ref[...] = logits                             # lane-dense 128-wide store


def prepare_vbow_params(params, weight_dtype=jnp.bfloat16):
    """One-time param preparation (call once, reuse across forward calls).

    Pads/fuses/transposes the weights so the kernel sees lane-dense,
    weight-resident VMEM operands:
      * W_in_aug   (V_pad, E_pad): row 0 zeroed (pad-token mask), last row
        carries input_bias (cols :E) and a 1.0 marker in the last column.
      * W_mulv_aug (E_pad, MULV_pad): [W_mu | W_lv] in cols :2K, with
        b_mu | b_lv in the last row (applied through the ones column of h).
      * W_out_t    (K, VOUT_pad): output_embedding.T, zero-padded columns.
      * output_bias (1, VOUT_pad): kept f32.
    """
    W_in = params["input_embedding"]           # (V_in, E)
    V_in, E = W_in.shape
    W_mu, W_lv = params["W_mu"], params["W_lv"]  # (E, K)
    K = W_mu.shape[1]
    W_out = params["output_embedding"]         # (V_out, K)
    V_out = W_out.shape[0]

    v_pad = _round_up(V_in + 1, 128)           # +1 reserves the bias row
    e_pad = _round_up(E + 1, 128)              # +1 reserves the ones column
    mulv_pad = _round_up(2 * K, 128)
    vout_pad = _round_up(V_out, 128)

    w_in_aug = jnp.zeros((v_pad, e_pad), jnp.float32)
    w_in_aug = w_in_aug.at[1:V_in, :E].set(W_in[1:])            # row 0 stays zero
    w_in_aug = w_in_aug.at[v_pad - 1, :E].set(params["input_bias"])
    w_in_aug = w_in_aug.at[v_pad - 1, e_pad - 1].set(1.0)       # ones marker

    w_mulv_aug = jnp.zeros((e_pad, mulv_pad), jnp.float32)
    w_mulv_aug = w_mulv_aug.at[:E, :K].set(W_mu)
    w_mulv_aug = w_mulv_aug.at[:E, K:2 * K].set(W_lv)
    w_mulv_aug = w_mulv_aug.at[e_pad - 1, :K].set(params["b_mu"])
    w_mulv_aug = w_mulv_aug.at[e_pad - 1, K:2 * K].set(params["b_lv"])

    w_out_t = jnp.zeros((K, vout_pad), jnp.float32)
    w_out_t = w_out_t.at[:, :V_out].set(W_out.T)

    obias = jnp.zeros((1, vout_pad), jnp.float32)
    obias = obias.at[0, :V_out].set(params["output_bias"])

    return {
        "w_in_aug": w_in_aug.astype(weight_dtype),
        "w_mulv_aug": w_mulv_aug.astype(weight_dtype),
        "w_out_t": w_out_t.astype(weight_dtype),
        "output_bias": obias,                  # f32
    }


@functools.partial(jax.jit, static_argnames=("num_latent", "output_dim", "b_tile"))
def vbow_forward(x, eps, w_in_aug, w_mulv_aug, w_out_t, output_bias, *,
                 num_latent, output_dim, b_tile=128):
    """Returns (logits, mu, logvar) matching the PyTorch module's forward()."""
    x = x.astype(jnp.int32)
    eps = eps.astype(jnp.float32)
    B, L = x.shape
    K = num_latent
    v_pad, e_pad = w_in_aug.shape
    mulv_pad = w_mulv_aug.shape[1]
    vout_pad = w_out_t.shape[1]

    bt = min(b_tile, _round_up(B, 8))
    Bp = _round_up(B, bt)
    if Bp != B:
        x = jnp.pad(x, ((0, Bp - B), (0, 0)))          # pad token 0 -> masked out
        eps = jnp.pad(eps, ((0, Bp - B), (0, 0)))

    grid = (Bp // bt,)
    logits_p, mulv_p = pl.pallas_call(
        vbow_kernel,
        out_shape=(jax.ShapeDtypeStruct((Bp, vout_pad), jnp.float32),
                   jax.ShapeDtypeStruct((Bp, mulv_pad), jnp.float32)),
        grid_spec=pltpu.PrefetchScalarGridSpec(
            num_scalar_prefetch=0,
            grid=grid,
            in_specs=[
                pl.BlockSpec((bt, L), lambda i: (i, 0)),            # token ids (batched)
                pl.BlockSpec((bt, K), lambda i: (i, 0)),            # eps (batched)
                pl.BlockSpec((v_pad, e_pad), lambda i: (0, 0)),     # W_in_aug (resident)
                pl.BlockSpec((e_pad, mulv_pad), lambda i: (0, 0)),  # W_mu|W_lv (resident)
                pl.BlockSpec((K, vout_pad), lambda i: (0, 0)),      # W_out^T (resident)
                pl.BlockSpec((1, vout_pad), lambda i: (0, 0)),      # output bias (resident)
            ],
            out_specs=(
                pl.BlockSpec((bt, vout_pad), lambda i: (i, 0)),     # logits slab
                pl.BlockSpec((bt, mulv_pad), lambda i: (i, 0)),     # mu|logvar slab
            ),
        ),
        compiler_params=pltpu.CompilerParams(
            dimension_semantics=("parallel",),       # shards batch over v7x's 2 TCs
            vmem_limit_bytes=32 * 1024 * 1024),      # fits v7x's 64 MiB with headroom
    )(x, eps, w_in_aug, w_mulv_aug, w_out_t, output_bias)

    logits = logits_p[:B, :output_dim]
    mu = mulv_p[:B, :K]
    logvar = mulv_p[:B, K:2 * K]
    return logits, mu, logvar


def reference_forward(x, params, eps, weight_dtype=jnp.float32):
    """Pure-JAX reference. weight_dtype=bf16 mirrors the kernel's precision
    (bf16 weights / activations at MXU inputs, f32 accumulation)."""
    f32 = jnp.float32

    def q(a):
        return a.astype(weight_dtype).astype(f32)

    W_in = q(params["input_embedding"])
    emb = W_in[x]                                        # (B, L, E)
    mask = (x > 0).astype(f32)
    bow = jnp.einsum("bl,ble->be", mask, emb)
    h = jnp.maximum(bow + q(params["input_bias"]), 0.0)
    h_c = h.astype(weight_dtype)
    mu = jnp.dot(h_c, params["W_mu"].astype(weight_dtype),
                 preferred_element_type=f32) + q(params["b_mu"])
    lv = jnp.dot(h_c, params["W_lv"].astype(weight_dtype),
                 preferred_element_type=f32) + q(params["b_lv"])
    z = eps * jnp.exp(0.5 * lv) + mu
    logits = jnp.dot(z.astype(weight_dtype),
                     params["output_embedding"].T.astype(weight_dtype),
                     preferred_element_type=f32) + params["output_bias"]
    return logits, mu, lv


if __name__ == "__main__":
    # Small shapes consistent with the module; batch sized to exercise the grid.
    B, L = 256, 8               # batch, bag-of-words sequence length
    input_dim = 50              # input vocab size
    output_dim = 64             # output vocab size
    embedding_dim = 32
    num_latent_factors = 16

    key = jax.random.PRNGKey(0)
    ks = jax.random.split(key, 8)

    bound = 1.0 / math.sqrt(input_dim)
    params = {
        "input_embedding": jax.random.uniform(
            ks[0], (input_dim, embedding_dim), jnp.float32, -bound, bound),
        "output_embedding": jax.random.normal(
            ks[1], (output_dim, num_latent_factors), jnp.float32),
        "input_bias": jnp.zeros((embedding_dim,), jnp.float32),
        "output_bias": jnp.zeros((output_dim,), jnp.float32),
        # Linear(embedding_dim -> num_latent_factors), stored as (E, K) for h @ W
        "W_mu": 0.1 * jax.random.normal(
            ks[2], (embedding_dim, num_latent_factors), jnp.float32),
        "b_mu": 0.1 * jax.random.normal(ks[3], (num_latent_factors,), jnp.float32),
        "W_lv": 0.1 * jax.random.normal(
            ks[4], (embedding_dim, num_latent_factors), jnp.float32),
        "b_lv": 0.1 * jax.random.normal(ks[5], (num_latent_factors,), jnp.float32),
    }

    x = jax.random.randint(ks[6], (B, L), 0, input_dim, dtype=jnp.int32)
    eps = jax.random.normal(ks[7], (B, num_latent_factors), jnp.float32)

    # One-time weight preparation (fusion / padding / transpose / bf16 cast).
    prep = prepare_vbow_params(params, weight_dtype=jnp.bfloat16)

    logits, mu, logvar = jax.block_until_ready(vbow_forward(
        x, eps, prep["w_in_aug"], prep["w_mulv_aug"], prep["w_out_t"],
        prep["output_bias"], num_latent=num_latent_factors,
        output_dim=output_dim))

    # Reference mirrors the kernel's bf16-weight / f32-accumulate precision;
    # tolerances loosened accordingly (per the perf review's note on bf16).
    ref_logits, ref_mu, ref_lv = reference_forward(
        x, params, eps, weight_dtype=jnp.bfloat16)

    assert logits.shape == (B, output_dim)
    assert mu.shape == (B, num_latent_factors)
    assert logvar.shape == (B, num_latent_factors)
    assert np.allclose(np.asarray(mu), np.asarray(ref_mu), atol=1e-2, rtol=1e-2)
    assert np.allclose(np.asarray(logvar), np.asarray(ref_lv), atol=1e-2, rtol=1e-2)
    assert np.allclose(np.asarray(logits), np.asarray(ref_logits), atol=5e-2, rtol=5e-2)

    print("KERNEL_OK")
</pallas_src>

<mosaic_0001>
module attributes {stable_mosaic.version = 11 : i64} {
  func.func @vbow_kernel(%arg0: i32, %arg1: memref<128x8xi32, #tpu.memory_space<vmem>>, %arg2: memref<128x16xf32, #tpu.memory_space<vmem>>, %arg3: memref<128x128xbf16, #tpu.memory_space<vmem>>, %arg4: memref<128x128xbf16, #tpu.memory_space<vmem>>, %arg5: memref<16x128xbf16, #tpu.memory_space<vmem>>, %arg6: memref<1x128xf32, #tpu.memory_space<vmem>>, %arg7: memref<128x128xf32, #tpu.memory_space<vmem>>, %arg8: memref<128x128xf32, #tpu.memory_space<vmem>>) attributes {dimension_semantics = [#tpu.dimension_semantics<parallel>], iteration_bounds = array<i64: 2>, scalar_prefetch = 0 : i64, scratch_operands = 0 : i64, tpu.core_type = #tpu.core_type<tc>, window_params = [{transform_indices = @transform_0, window_bounds = array<i64: 128, 8>}, {transform_indices = @transform_1, window_bounds = array<i64: 128, 16>}, {pipeline_mode = #tpu.pipeline_mode<synchronous>, transform_indices = @transform_2, window_bounds = array<i64: 128, 128>}, {pipeline_mode = #tpu.pipeline_mode<synchronous>, transform_indices = @transform_3, window_bounds = array<i64: 128, 128>}, {pipeline_mode = #tpu.pipeline_mode<synchronous>, transform_indices = @transform_4, window_bounds = array<i64: 16, 128>}, {pipeline_mode = #tpu.pipeline_mode<synchronous>, transform_indices = @transform_5, window_bounds = array<i64: 1, 128>}, {transform_indices = @transform_6, window_bounds = array<i64: 128, 128>}, {transform_indices = @transform_7, window_bounds = array<i64: 128, 128>}]} {
    %c0 = arith.constant 0 : index
    %c0_0 = arith.constant 0 : index
    %0 = vector.load %arg1[%c0, %c0_0] : memref<128x8xi32, #tpu.memory_space<vmem>>, vector<128x8xi32>
    %1 = tpu.iota {dimensions = array<i32: 1>} : vector<128x128xi32>
    %c127_i32 = arith.constant 127 : i32
    %2 = vector.broadcast %c127_i32 : i32 to vector<128x128xi32>
    %3 = arith.cmpi eq, %1, %2 : vector<128x128xi32>
    %4 = arith.extui %3 : vector<128x128xi1> to vector<128x128xi32>
    %5 = arith.sitofp %4 : vector<128x128xi32> to vector<128x128xf32>
    %6 = vector.extract_strided_slice %0 {offsets = [0, 0], sizes = [128, 1], strides = [1, 1]} : vector<128x8xi32> to vector<128x1xi32>
    %7 = vector.broadcast %6 : vector<128x1xi32> to vector<128x128xi32>
    %8 = arith.cmpi eq, %1, %7 : vector<128x128xi32>
    %9 = arith.extui %8 : vector<128x128xi1> to vector<128x128xi32>
    %10 = arith.sitofp %9 : vector<128x128xi32> to vector<128x128xf32>
    %11 = arith.addf %5, %10 : vector<128x128xf32>
    %12 = vector.extract_strided_slice %0 {offsets = [0, 1], sizes = [128, 1], strides = [1, 1]} : vector<128x8xi32> to vector<128x1xi32>
    %13 = vector.broadcast %12 : vector<128x1xi32> to vector<128x128xi32>
    %14 = arith.cmpi eq, %1, %13 : vector<128x128xi32>
    %15 = arith.extui %14 : vector<128x128xi1> to vector<128x128xi32>
    %16 = arith.sitofp %15 : vector<128x128xi32> to vector<128x128xf32>
    %17 = arith.addf %11, %16 : vector<128x128xf32>
    %18 = vector.extract_strided_slice %0 {offsets = [0, 2], sizes = [128, 1], strides = [1, 1]} : vector<128x8xi32> to vector<128x1xi32>
    %19 = vector.broadcast %18 : vector<128x1xi32> to vector<128x128xi32>
    %20 = arith.cmpi eq, %1, %19 : vector<128x128xi32>
    %21 = arith.extui %20 : vector<128x128xi1> to vector<128x128xi32>
    %22 = arith.sitofp %21 : vector<128x128xi32> to vector<128x128xf32>
    %23 = arith.addf %17, %22 : vector<128x128xf32>
    %24 = vector.extract_strided_slice %0 {offsets = [0, 3], sizes = [128, 1], strides = [1, 1]} : vector<128x8xi32> to vector<128x1xi32>
    %25 = vector.broadcast %24 : vector<128x1xi32> to vector<128x128xi32>
    %26 = arith.cmpi eq, %1, %25 : vector<128x128xi32>
    %27 = arith.extui %26 : vector<128x128xi1> to vector<128x128xi32>
    %28 = arith.sitofp %27 : vector<128x128xi32> to vector<128x128xf32>
    %29 = arith.addf %23, %28 : vector<128x128xf32>
    %30 = vector.extract_strided_slice %0 {offsets = [0, 4], sizes = [128, 1], strides = [1, 1]} : vector<128x8xi32> to vector<128x1xi32>
    %31 = vector.broadcast %30 : vector<128x1xi32> to vector<128x128xi32>
    %32 = arith.cmpi eq, %1, %31 : vector<128x128xi32>
    %33 = arith.extui %32 : vector<128x128xi1> to vector<128x128xi32>
    %34 = arith.sitofp %33 : vector<128x128xi32> to vector<128x128xf32>
    %35 = arith.addf %29, %34 : vector<128x128xf32>
    %36 = vector.extract_strided_slice %0 {offsets = [0, 5], sizes = [128, 1], strides = [1, 1]} : vector<128x8xi32> to vector<128x1xi32>
    %37 = vector.broadcast %36 : vector<128x1xi32> to vector<128x128xi32>
    %38 = arith.cmpi eq, %1, %37 : vector<128x128xi32>
    %39 = arith.extui %38 : vector<128x128xi1> to vector<128x128xi32>
    %40 = arith.sitofp %39 : vector<128x128xi32> to vector<128x128xf32>
    %41 = arith.addf %35, %40 : vector<128x128xf32>
    %42 = vector.extract_strided_slice %0 {offsets = [0, 6], sizes = [128, 1], strides = [1, 1]} : vector<128x8xi32> to vector<128x1xi32>
    %43 = vector.broadcast %42 : vector<128x1xi32> to vector<128x128xi32>
    %44 = arith.cmpi eq, %1, %43 : vector<128x128xi32>
    %45 = arith.extui %44 : vector<128x128xi1> to vector<128x128xi32>
    %46 = arith.sitofp %45 : vector<128x128xi32> to vector<128x128xf32>
    %47 = arith.addf %41, %46 : vector<128x128xf32>
    %48 = vector.extract_strided_slice %0 {offsets = [0, 7], sizes = [128, 1], strides = [1, 1]} : vector<128x8xi32> to vector<128x1xi32>
    %49 = vector.broadcast %48 : vector<128x1xi32> to vector<128x128xi32>
    %50 = arith.cmpi eq, %1, %49 : vector<128x128xi32>
    %51 = arith.extui %50 : vector<128x128xi1> to vector<128x128xi32>
    %52 = arith.sitofp %51 : vector<128x128xi32> to vector<128x128xf32>
    %53 = arith.addf %47, %52 : vector<128x128xf32>
    %54 = arith.truncf %53 : vector<128x128xf32> to vector<128x128xbf16>
    %c0_1 = arith.constant 0 : index
    %c0_2 = arith.constant 0 : index
    %55 = vector.load %arg3[%c0_1, %c0_2] : memref<128x128xbf16, #tpu.memory_space<vmem>>, vector<128x128xbf16>
    %cst = arith.constant dense<0.000000e+00> : vector<128x128xf32>
    %56 = tpu.matmul %54, %55, %cst {dimension_numbers = #tpu.dot_dimension_numbers<[1], [0], [0], [1], [0, 0, 1, 1], [], []>} : vector<128x128xbf16>, vector<128x128xbf16>, vector<128x128xf32> -> vector<128x128xf32>
    %cst_3 = arith.constant 0.000000e+00 : f32
    %57 = vector.broadcast %cst_3 : f32 to vector<128x128xf32>
    %58 = arith.maximumf %56, %57 : vector<128x128xf32>
    %59 = arith.truncf %58 : vector<128x128xf32> to vector<128x128xbf16>
    %c0_4 = arith.constant 0 : index
    %c0_5 = arith.constant 0 : index
    %60 = vector.load %arg4[%c0_4, %c0_5] : memref<128x128xbf16, #tpu.memory_space<vmem>>, vector<128x128xbf16>
    %cst_6 = arith.constant dense<0.000000e+00> : vector<128x128xf32>
    %61 = tpu.matmul %59, %60, %cst_6 {dimension_numbers = #tpu.dot_dimension_numbers<[1], [0], [0], [1], [0, 0, 1, 1], [], []>} : vector<128x128xbf16>, vector<128x128xbf16>, vector<128x128xf32> -> vector<128x128xf32>
    %c0_7 = arith.constant 0 : index
    %c0_8 = arith.constant 0 : index
    %62 = vector.load %arg8[%c0_7, %c0_8] : memref<128x128xf32, #tpu.memory_space<vmem>>, vector<128x128xf32>
    tpu.vector_store %arg8[%c0_7, %c0_8], %61 {strides = array<i32>} : memref<128x128xf32, #tpu.memory_space<vmem>>, vector<128x128xf32>,
    %c0_9 = arith.constant 0 : index
    %c0_10 = arith.constant 0 : index
    %63 = vector.load %arg8[%c0_9, %c0_10] : memref<128x128xf32, #tpu.memory_space<vmem>>, vector<128x16xf32>
    %c0_11 = arith.constant 0 : index
    %c16 = arith.constant 16 : index
    %64 = vector.load %arg8[%c0_11, %c16] : memref<128x128xf32, #tpu.memory_space<vmem>>, vector<128x16xf32>
    %c0_12 = arith.constant 0 : index
    %c0_13 = arith.constant 0 : index
    %65 = vector.load %arg2[%c0_12, %c0_13] : memref<128x16xf32, #tpu.memory_space<vmem>>, vector<128x16xf32>
    %cst_14 = arith.constant 5.000000e-01 : f32
    %66 = vector.broadcast %cst_14 : f32 to vector<128x16xf32>
    %67 = arith.mulf %66, %64 : vector<128x16xf32>
    %68 = math.exp %67 : vector<128x16xf32>
    %69 = arith.mulf %65, %68 : vector<128x16xf32>
    %70 = arith.addf %69, %63 : vector<128x16xf32>
    %71 = arith.truncf %70 : vector<128x16xf32> to vector<128x16xbf16>
    %c0_15 = arith.constant 0 : index
    %c0_16 = arith.constant 0 : index
    %72 = vector.load %arg5[%c0_15, %c0_16] : memref<16x128xbf16, #tpu.memory_space<vmem>>, vector<16x128xbf16>
    %cst_17 = arith.constant dense<0.000000e+00> : vector<128x128xf32>
    %73 = tpu.matmul %71, %72, %cst_17 {dimension_numbers = #tpu.dot_dimension_numbers<[1], [0], [0], [1], [0, 0, 1, 1], [], []>} : vector<128x16xbf16>, vector<16x128xbf16>, vector<128x128xf32> -> vector<128x128xf32>
    %c0_18 = arith.constant 0 : index
    %c0_19 = arith.constant 0 : index
    %74 = vector.load %arg6[%c0_18, %c0_19] : memref<1x128xf32, #tpu.memory_space<vmem>>, vector<1x128xf32>
    %75 = vector.broadcast %74 : vector<1x128xf32> to vector<128x128xf32>
    %76 = arith.addf %73, %75 : vector<128x128xf32>
    %c0_20 = arith.constant 0 : index
    %c0_21 = arith.constant 0 : index
    %77 = vector.load %arg7[%c0_20, %c0_21] : memref<128x128xf32, #tpu.memory_space<vmem>>, vector<128x128xf32>
    tpu.vector_store %arg7[%c0_20, %c0_21], %76 {strides = array<i32>} : memref<128x128xf32, #tpu.memory_space<vmem>>, vector<128x128xf32>,
    return
  }
  func.func @transform_0(%arg0: i32) -> (i32, i32) {
    %c0_i32 = arith.constant 0 : i32
    %c0_i32_0 = arith.constant 0 : i32
    return %arg0, %c0_i32 : i32, i32
  }
  func.func @transform_1(%arg0: i32) -> (i32, i32) {
    %c0_i32 = arith.constant 0 : i32
    %c0_i32_0 = arith.constant 0 : i32
    return %arg0, %c0_i32 : i32, i32
  }
  func.func @transform_2(%arg0: i32) -> (i32, i32) {
    %c0_i32 = arith.constant 0 : i32
    %c0_i32_0 = arith.constant 0 : i32
    %c0_i32_1 = arith.constant 0 : i32
    return %c0_i32, %c0_i32_0 : i32, i32
  }
  func.func @transform_3(%arg0: i32) -> (i32, i32) {
    %c0_i32 = arith.constant 0 : i32
    %c0_i32_0 = arith.constant 0 : i32
    %c0_i32_1 = arith.constant 0 : i32
    return %c0_i32, %c0_i32_0 : i32, i32
  }
  func.func @transform_4(%arg0: i32) -> (i32, i32) {
    %c0_i32 = arith.constant 0 : i32
    %c0_i32_0 = arith.constant 0 : i32
    %c0_i32_1 = arith.constant 0 : i32
    return %c0_i32, %c0_i32_0 : i32, i32
  }
  func.func @transform_5(%arg0: i32) -> (i32, i32) {
    %c0_i32 = arith.constant 0 : i32
    %c0_i32_0 = arith.constant 0 : i32
    %c0_i32_1 = arith.constant 0 : i32
    return %c0_i32, %c0_i32_0 : i32, i32
  }
  func.func @transform_6(%arg0: i32) -> (i32, i32) {
    %c0_i32 = arith.constant 0 : i32
    %c0_i32_0 = arith.constant 0 : i32
    return %arg0, %c0_i32 : i32, i32
  }
  func.func @transform_7(%arg0: i32) -> (i32, i32) {
    %c0_i32 = arith.constant 0 : i32
    %c0_i32_0 = arith.constant 0 : i32
    return %arg0, %c0_i32 : i32, i32
  }
}

</mosaic_0001>

<bundles_post_ra>
// kernel: vbow_forward.1
= control target key start
LH: loop header
LB: loop body
LE: loop exit
PB: predicated region body
PF: predicated region fallthrough
CT: control target
= control target key end

     0   :  { %s2532_s24 = smov 0   ;;  %s3520_s0 = inlined_call_operand.vmem [shape: s32[256,8], index: 0, kind: input, shape index: {}]   ;;  %s3521_s1 = inlined_call_operand.vmem [shape: f32[256,16], index: 1, kind: input, shape index: {}]   ;;  %s3522_s2 = inlined_call_operand.vmem [shape: bf16[128,128], index: 2, kind: input, shape index: {}]   ;;  %s3523_s3 = inlined_call_operand.vmem [shape: bf16[128,128], index: 3, kind: input, shape index: {}]   ;;  %s3524_s4 = inlined_call_operand.vmem [shape: bf16[16,128], index: 4, kind: input, shape index: {}]   ;;  %s3525_s5 = inlined_call_operand.vmem [shape: f32[1,128], index: 5, kind: input, shape index: {}]   ;;  %s3526_s6 = inlined_call_operand.vmem [shape: f32[256,128], index: 6, kind: output, shape index: {0}]   ;;  %s3527_s7 = inlined_call_operand.vmem [shape: f32[256,128], index: 7, kind: output, shape index: {1}]  }
   0x1 LB: > { %s2045_s25 = sadd.s32 4294967295, %s2480_s24   ;;  %p2049_p0 = scmp.ge.s32.totalorder %s2480_s24, 1  ;;  %s2480_s24 = sphi %s2532_s24, %s18_s24  }
   0x2   : > { %p252_p1 = scmp.lt.s32.totalorder %s2480_s24, 3 }
   0x4   : > { %p253_p2 = pnand %p2049_p0, %p252_p1 }
   0x5   : > { %s2050_s26 = sshll.u32 (!%p253_p2), %s2045_s25, 4  ;;  %v2482_v0 = vmov (!%p253_p2), 7   ;;  %v2483_v1 = vmov (!%p253_p2), 0   ;;  %v2484_v7 = vmov (!%p253_p2), 1   ;;  %v2485_v9 = vmov (!%p253_p2), 2   ;;  %v2423_v34 = vld [vmem:[%s3522_s2] sm:$0xff] (!%p253_p2)  }
   0x6   : > { %256 = sbr.rel (%p253_p2) target bundleno = 1311 (0x51f), region = 44  ;;  %2377 = vset.pattern.permute.xlu0 (!%p253_p2), %v2482_v0  ;;  %2358 = vset.pattern.permute.xlu1 (!%p253_p2), %v2483_v1  ;;  %p295_p3 = scmp.lt.s32.totalorder (!%p253_p2), %s2050_s26, 31  ;;  %v2486_v12 = vmov (!%p253_p2), 3   ;;  %v2487_v16 = vmov (!%p253_p2), 4   ;;  %v2488_v18 = vmov (!%p253_p2), 5   ;;  %v2489_v19 = vmov (!%p253_p2), 6  }
   0x7   : > { %2256 = vmatprep.subr.bf16.mxu0 (!%p253_p2), %v2423_v34  ;;  %v2424_v37 = vld [vmem:[%s3522_s2 + $0x8] sm:$0xff] (!%p253_p2)   ;;  %v2425_v39 = vld [vmem:[%s3522_s2 + $0x10] sm:$0xff] (!%p253_p2)   ;;  %v2426_v42 = vld [vmem:[%s3522_s2 + $0x18] sm:$0xff] (!%p253_p2)   ;;  %v335_v57 = vlaneseq (!%p253_p2)  ;;  %v2490_v63 = vmov (!%p253_p2), 0.0   ;;  %s2491_s25 = smov (!%p253_p2), 112  }
   0x8   : > { %2257 = vmatpush3.bf16.msra.mxu0 (!%p253_p2), %v2423_v34  ;;  %v2427_v46 = vld [vmem:[%s3522_s2 + $0x20] sm:$0xff] (!%p253_p2)   ;;  %v2428_v50 = vld [vmem:[%s3522_s2 + $0x28] sm:$0xff] (!%p253_p2)   ;;  %v2429_v53 = vld [vmem:[%s3522_s2 + $0x30] sm:$0xff] (!%p253_p2)  }
   0x9   : > { %2258 = vmatprep.subr.bf16.mxu0 (!%p253_p2), %v2424_v37  ;;  %v2430_v56 = vld [vmem:[%s3522_s2 + $0x38] sm:$0xff] (!%p253_p2)   ;;  %v2787_v60 = vand.u32 (!%p253_p2), 127, %v335_v57 }
   0xb   : > { %vm337_vm1 = vcmp.eq.s32.totalorder (!%p253_p2), %v2787_v60, 127 }
   0xc   : > { %2259 = vmatpush3.bf16.msra.mxu0 (!%p253_p2), %v2424_v37 }
   0xd   : > { %s3529_s26 = smov (!%p295_p3, %s2050_s26), 31  ;;  %2260 = vmatprep.subr.bf16.mxu0 %v2425_v39 }
   0xe   : > { %s2542_s27 = sshll.u32 %s3529_s26, 3 }
   0xf   : > { %s2548_s30 = scalar_lea.vmem %s3520_s0, %s2542_s27  ;;  %s3365_s21 = scalar_lea.vmem %s3527_s7, %s2542_s27 }
  0x10   : > { %v2551_v2 = vld [vmem:[%s2548_s30 + $0x10] sm:$0xff]  ;;  %v2559_v4 = vld [vmem:[%s2548_s30 + $0x18] sm:$0xff]  ;;  %v2564_v5 = vld [vmem:[%s2548_s30 + $0x8] sm:$0xff]  ;;  %2261 = vmatpush3.bf16.msra.mxu0 %v2425_v39  ;;  %s3406_s29 = scalar_lea.vmem %s3521_s1, %s2542_s27  ;;  %s3499_s11 = scalar_lea.vmem %s3526_s6, %s2542_s27 }
  0x11   : > { %1131 = vperm.xlu0 %2377, %v2551_v2   ;;  %347 = vperm.xlu1 %2358, %v2551_v2   ;;  %v2556_v3 = vld [vmem:[%s2548_s30 + $0x30] sm:$0xff]  ;;  %v2567_v6 = vld [vmem:[%s2548_s30] sm:$0xff]  ;;  %v2576_v8 = vld [vmem:[%s2548_s30 + $0x28] sm:$0xff] }
  0x12   : > { %v2584_v10 = vld [vmem:[%s2548_s30 + $0x48] sm:$0xff]  ;;  %v2589_v11 = vld [vmem:[%s2548_s30 + $0x50] sm:$0xff]  ;;  %v2604_v15 = vld [vmem:[%s2548_s30 + $0x20] sm:$0xff]  ;;  %2262 = vmatprep.subr.bf16.mxu0 %v2426_v42 }
  0x13   : > { %v2594_v13 = vld [vmem:[%s2548_s30 + $0x68] sm:$0xff]  ;;  %v2599_v14 = vld [vmem:[%s2548_s30 + $0x70] sm:$0xff]  ;;  %v2616_v17 = vld [vmem:[%s2548_s30 + $0x38] sm:$0xff] }
  0x14   : > { %v2680_v24 = vld [vmem:[%s2548_s30 + $0x40] sm:$0xff]  ;;  %v2704_v31 = vld [vmem:[%s2548_s30 + $0x58] sm:$0xff]  ;;  %2263 = vmatpush3.bf16.msra.mxu0 %v2426_v42 }
  0x15   : > { %1143 = vperm.xlu0 %2377, %v2556_v3   ;;  %350 = vperm.xlu1 %2358, %v2559_v4   ;;  %v2744_v44 = vld [vmem:[%s2548_s30 + $0x60] sm:$0xff]  ;;  %v2755_v48 = vld [vmem:[%s2548_s30 + $0x78] sm:$0xff] }
  0x16   : > { %2264 = vmatprep.subr.bf16.mxu0 %v2427_v46 }
  0x18   : > { %2265 = vmatpush3.bf16.msra.mxu0 %v2427_v46 }
  0x19   : > { %2394 = vset.pattern.permute.xlu0 %v2483_v1  ;;  %2359 = vset.pattern.permute.xlu1 %v2484_v7 }
  0x1a   : > { %456 = vperm.xlu1 %2359, %v2564_v5   ;;  %341 = vperm.xlu0 %2394, %v2567_v6  }
  0x1b   : > { %2266 = vmatprep.subr.bf16.mxu0 %v2428_v50 }
  0x1c   : > { %2267 = vmatpush3.bf16.msra.mxu0 %v2428_v50 }
  0x1d   : > { %2268 = vmatprep.subr.bf16.mxu0 %v2429_v53 }
  0x1e   : > { %459 = vperm.xlu1 %2359, %v2551_v2   ;;  %344 = vperm.xlu0 %2394, %v2564_v5  }
  0x20   : > { %2269 = vmatpush3.bf16.msra.mxu0 %v2429_v53 }
  0x21   : > { %2270 = vmatprep.subr.bf16.mxu0 %v2430_v56 }
  0x22   : > { %2360 = vset.pattern.permute.xlu1 %v2485_v9  ;;  %356 = vperm.xlu0 %2394, %v2576_v8  }
  0x23   : > { %565 = vperm.xlu1 %2360, %v2567_v6  }
  0x24   : > { %2271 = vmatpush3.bf16.msra.mxu0 %v2430_v56 }
  0x26   : > { %359 = vperm.xlu0 %2394, %v2556_v3  }
  0x27   : > { %571 = vperm.xlu1 %2360, %v2551_v2  }
  0x2a   : > { %368 = vperm.xlu0 %2394, %v2584_v10  }
  0x2b   : > { %574 = vperm.xlu1 %2360, %v2559_v4  }
  0x2e   : > { %371 = vperm.xlu0 %2394, %v2589_v11  }
  0x2f   : > { %2361 = vset.pattern.permute.xlu1 %v2486_v12 }
  0x30   : > { %680 = vperm.xlu1 %2361, %v2564_v5  }
  0x32   : > { %380 = vperm.xlu0 %2394, %v2594_v13  }
  0x34   : > { %683 = vperm.xlu1 %2361, %v2551_v2  }
  0x36   : > { %383 = vperm.xlu0 %2394, %v2599_v14  }
  0x38   : > { %2362 = vset.pattern.permute.xlu1 %v2483_v1 }
  0x39   : > { %353 = vperm.xlu1 %2362, %v2604_v15  }
  0x3a   : > { %2398 = vset.pattern.permute.xlu0 %v2484_v7 }
  0x3b   : > { %453 = vperm.xlu0 %2398, %v2567_v6  }
  0x3d   : > { %2363 = vset.pattern.permute.xlu1 %v2487_v16 }
  0x3e   : > { %789 = vperm.xlu1 %2363, %v2567_v6  }
  0x3f   : > { %462 = vperm.xlu0 %2398, %v2559_v4  }
  0x42   : > { %792 = vperm.xlu1 %2363, %v2564_v5  }
  0x43   : > { %468 = vperm.xlu0 %2398, %v2576_v8  }
  0x46   : > { %2364 = vset.pattern.permute.xlu1 %v2483_v1 }
  0x47   : > { %471 = vperm.xlu0 %2398, %v2556_v3   ;;  %362 = vperm.xlu1 %2364, %v2616_v17  }
  0x4b   : > { %480 = vperm.xlu0 %2398, %v2584_v10   ;;  %2365 = vset.pattern.permute.xlu1 %v2487_v16 }
  0x4c   : > { %798 = vperm.xlu1 %2365, %v2559_v4  }
  0x4f   : > { %483 = vperm.xlu0 %2398, %v2589_v11  }
  0x50   : > { %2366 = vset.pattern.permute.xlu1 %v2484_v7 }
  0x51   : > { %465 = vperm.xlu1 %2366, %v2604_v15  }
  0x53   : > { %492 = vperm.xlu0 %2398, %v2594_v13  }
  0x55   : > { %2367 = vset.pattern.permute.xlu1 %v2488_v18 }
  0x56   : > { %901 = vperm.xlu1 %2367, %v2567_v6  }
  0x57   : > { %495 = vperm.xlu0 %2398, %v2599_v14  }
  0x5a   : > { %904 = vperm.xlu1 %2367, %v2564_v5  }
  0x5b   : > { %2403 = vset.pattern.permute.xlu0 %v2485_v9 }
  0x5c   : > { %568 = vperm.xlu0 %2403, %v2564_v5  }
  0x5e   : > { %2368 = vset.pattern.permute.xlu1 %v2484_v7 }
  0x5f   : > { %474 = vperm.xlu1 %2368, %v2616_v17  }
  0x60   : > { %580 = vperm.xlu0 %2403, %v2576_v8  }
  0x63   : > { %2369 = vset.pattern.permute.xlu1 %v2488_v18 }
  0x64   : > { %583 = vperm.xlu0 %2403, %v2556_v3   ;;  %910 = vperm.xlu1 %2369, %v2559_v4  }
  0x68   : > { %592 = vperm.xlu0 %2403, %v2584_v10   ;;  %2370 = vset.pattern.permute.xlu1 %v2485_v9 }
  0x69   : > { %577 = vperm.xlu1 %2370, %v2604_v15  }
  0x6c   : > { %595 = vperm.xlu0 %2403, %v2589_v11  }
  0x6d   : > { %2371 = vset.pattern.permute.xlu1 %v2489_v19 }
  0x6e   : > { %1013 = vperm.xlu1 %2371, %v2567_v6  }
  0x70   : > { %604 = vperm.xlu0 %2403, %v2594_v13  }
  0x72   : > { %1016 = vperm.xlu1 %2371, %v2564_v5  }
  0x74   : > { %607 = vperm.xlu0 %2403, %v2599_v14  }
  0x76   : > { %2372 = vset.pattern.permute.xlu1 %v2485_v9 }
  0x77   : > { %586 = vperm.xlu1 %2372, %v2616_v17  }
  0x78   : > { %2408 = vset.pattern.permute.xlu0 %v2486_v12 }
  0x79   : > { %677 = vperm.xlu0 %2408, %v2567_v6  }
  0x7b   : > { %2373 = vset.pattern.permute.xlu1 %v2489_v19 }
  0x7c   : > { %1022 = vperm.xlu1 %2373, %v2559_v4  }
  0x7d   : > { %686 = vperm.xlu0 %2408, %v2559_v4  }
  0x80   : > { %2374 = vset.pattern.permute.xlu1 %v2486_v12 }
  0x81   : > { %692 = vperm.xlu0 %2408, %v2576_v8   ;;  %689 = vperm.xlu1 %2374, %v2604_v15  }
  0x85   : > { %695 = vperm.xlu0 %2408, %v2556_v3   ;;  %2375 = vset.pattern.permute.xlu1 %v2482_v0 }
  0x86   : > { %1125 = vperm.xlu1 %2375, %v2567_v6  }
  0x89   : > { %704 = vperm.xlu0 %2408, %v2584_v10  }
  0x8a   : > { %1128 = vperm.xlu1 %2375, %v2564_v5  }
  0x8d   : > { %707 = vperm.xlu0 %2408, %v2589_v11  }
  0x8e   : > { %2376 = vset.pattern.permute.xlu1 %v2486_v12 }
  0x8f   : > { %698 = vperm.xlu1 %2376, %v2616_v17  }
  0x90   : > { %v2667_v20 = vpop.permute.xlu1 %347  ;;  %v2669_v21 = vpop.permute.xlu0 %1131 }
  0x91   : > { %716 = vperm.xlu0 %2408, %v2594_v13  }
  0x93   : > { %2378 = vset.pattern.permute.xlu1 %v2482_v0 }
  0x94   : > { %v2673_v22 = vpop.permute.xlu1 %350  ;;  %1134 = vperm.xlu1 %2378, %v2559_v4   ;;  %v2676_v23 = vpop.permute.xlu0 %1143  ;;  %v2802_v4 = vsel %vm337_vm1, 1.0, %v2490_v63 }
  0x95   : > { %719 = vperm.xlu0 %2408, %v2599_v14  }
  0x98   : > { %2379 = vset.pattern.permute.xlu1 %v2483_v1 }
  0x99   : > { %v2683_v25 = vpop.permute.xlu1 %456  ;;  %2413 = vset.pattern.permute.xlu0 %v2487_v16  ;;  %v2686_v26 = vpop.permute.xlu0 %341  ;;  %365 = vperm.xlu1 %2379, %v2680_v24  }
  0x9a   : > { %795 = vperm.xlu0 %2413, %v2551_v2   ;;  %vm388_vm1 = vcmp.eq.s32.totalorder %v2787_v60, %v2686_v26 }
  0x9d   : > { %v2690_v27 = vpop.permute.xlu1 %459  ;;  %v2692_v28 = vpop.permute.xlu0 %344  ;;  %2380 = vset.pattern.permute.xlu1 %v2487_v16 }
  0x9e   : > { %807 = vperm.xlu0 %2413, %v2556_v3   ;;  %801 = vperm.xlu1 %2380, %v2604_v15  }
  0xa1   : > { %v2697_v29 = vpop.permute.xlu0 %356 }
  0xa2   : > { %819 = vperm.xlu0 %2413, %v2589_v11   ;;  %804 = vperm.xlu1 %2380, %v2576_v8   ;;  %v2701_v30 = vpop.permute.xlu1 %565  ;;  %vm393_vm4 = vcmp.eq.s32.totalorder %v2787_v60, %v2697_v29 }
  0xa5   : > { %v2706_v32 = vpop.permute.xlu0 %359 }
  0xa6   : > { %828 = vperm.xlu0 %2413, %v2594_v13   ;;  %2381 = vset.pattern.permute.xlu1 %v2483_v1  ;;  %v2710_v33 = vpop.permute.xlu1 %571  ;;  %vm394_vm6 = vcmp.eq.s32.totalorder %v2787_v60, %v2706_v32 }
  0xa7   : > { %374 = vperm.xlu1 %2381, %v2704_v31   ;;  %v2065_v56 = vsel %vm394_vm6, 1.0, %v2490_v63  ;;  %vm501_vm6 = vcmp.eq.s32.totalorder %v2787_v60, %v2683_v25 }
  0xa8   : > { %v442_v32 = vadd.f32 %v2065_v56, %v2802_v4 }
  0xa9   : > { %v2716_v35 = vpop.permute.xlu0 %368 }
  0xaa   : > { %2417 = vset.pattern.permute.xlu0 %v2488_v18  ;;  %v2719_v36 = vpop.permute.xlu1 %574  ;;  %vm397_vm8 = vcmp.eq.s32.totalorder %v2787_v60, %v2716_v35 }
  0xab   : > { %907 = vperm.xlu0 %2417, %v2551_v2   ;;  %2382 = vset.pattern.permute.xlu1 %v2487_v16 }
  0xac   : > { %810 = vperm.xlu1 %2382, %v2616_v17  }
  0xad   : > { %v2727_v38 = vpop.permute.xlu0 %371 }
  0xae   : > { %vm398_vm10 = vcmp.eq.s32.totalorder %v2787_v60, %v2727_v38 }
  0xaf   : > { %919 = vperm.xlu0 %2417, %v2556_v3   ;;  %v2733_v40 = vpop.permute.xlu1 %680 }
  0xb0   : > { %2383 = vset.pattern.permute.xlu1 %v2484_v7 }
  0xb1   : > { %477 = vperm.xlu1 %2383, %v2680_v24   ;;  %v381_v41 = vpop.permute.xlu0 %380 }
  0xb2   : > { %vm401_vm0 = vcmp.eq.s32.totalorder %v2787_v60, %v381_v41 }
  0xb3   : > { %931 = vperm.xlu0 %2417, %v2589_v11   ;;  %v2741_v43 = vpop.permute.xlu1 %683 }
  0xb5   : > { %2384 = vset.pattern.permute.xlu1 %v2488_v18  ;;  %v384_v45 = vpop.permute.xlu0 %383 }
  0xb6   : > { %913 = vperm.xlu1 %2384, %v2604_v15   ;;  %vm402_vm2 = vcmp.eq.s32.totalorder %v2787_v60, %v384_v45  ;;  %v2064_v45 = vsel %vm393_vm4, 1.0, %v2490_v63 }
  0xb7   : > { %937 = vperm.xlu0 %2417, %v2744_v44   ;;  %v441_v53 = vadd.f32 %v2064_v45, %v2802_v4  ;;  %v2069_v45 = vsel %vm398_vm10, 1.0, %v2490_v63  ;;  %vm725_vm10 = vcmp.eq.s32.totalorder %v2787_v60, %v2733_v40 }
  0xb8   : > { %v2752_v47 = vpop.permute.xlu1 %353  ;;  %v446_v56 = vadd.f32 %v2069_v45, %v2802_v4 }
  0xba   : > { %v2757_v49 = vpop.permute.xlu0 %453  ;;  %916 = vperm.xlu1 %2384, %v2576_v8  }
  0xbb   : > { %946 = vperm.xlu0 %2417, %v2755_v48   ;;  %vm500_vm4 = vcmp.eq.s32.totalorder %v2787_v60, %v2757_v49 }
  0xbd   : > { %v2764_v51 = vpop.permute.xlu1 %789 }
  0xbe   : > { %v2766_v52 = vpop.permute.xlu0 %462  ;;  %2385 = vset.pattern.permute.xlu1 %v2484_v7 }
  0xbf   : > { %2419 = vset.pattern.permute.xlu0 %v2489_v19  ;;  %486 = vperm.xlu1 %2385, %v2704_v31  }
  0xc0   : > { %1019 = vperm.xlu0 %2419, %v2551_v2   ;;  %v2072_v2 = vsel %vm401_vm0, 1.0, %v2490_v63 }
  0xc1   : > { %v2775_v54 = vpop.permute.xlu1 %792  ;;  %v449_v6 = vadd.f32 %v2072_v2, %v2802_v4 }
  0xc2   : > { %v469_v55 = vpop.permute.xlu0 %468 }
  0xc3   : > { %2386 = vset.pattern.permute.xlu1 %v2488_v18  ;;  %vm505_vm7 = vcmp.eq.s32.totalorder %v2787_v60, %v469_v55 }
  0xc4   : > { %1031 = vperm.xlu0 %2419, %v2556_v3   ;;  %922 = vperm.xlu1 %2386, %v2616_v17   ;;  %v2080_v57 = vsel %vm505_vm7, 1.0, %v2490_v63 }
  0xc5   : > { %v553_v55 = vadd.f32 %v2080_v57, %v441_v53 }
  0xc6   : > { %v2783_v58 = vpop.permute.xlu1 %362  ;;  %v472_v59 = vpop.permute.xlu0 %471 }
  0xc7   : > { %vm506_vm9 = vcmp.eq.s32.totalorder %v2787_v60, %v472_v59 }
  0xc8   : > { %1043 = vperm.xlu0 %2419, %v2589_v11   ;;  %2387 = vset.pattern.permute.xlu1 %v2485_v9 }
  0xc9   : > { %589 = vperm.xlu1 %2387, %v2680_v24  }
  0xca   : > { %v481_v61 = vpop.permute.xlu0 %480 }
  0xcb   : > { %v2791_v62 = vpop.permute.xlu1 %798  ;;  %vm509_vm11 = vcmp.eq.s32.totalorder %v2787_v60, %v481_v61 }
  0xcc   : > { %1052 = vperm.xlu0 %2419, %v2594_v13   ;;  %v2073_v13 = vsel %vm402_vm2, 1.0, %v2490_v63  ;;  %vm389_vm2 = vcmp.eq.s32.totalorder %v2787_v60, %v2692_v28 }
  0xcd   : > { %2388 = vset.pattern.permute.xlu1 %v2489_v19  ;;  %v450_v39 = vadd.f32 %v2073_v13, %v2802_v4  ;;  %v2068_v13 = vsel %vm397_vm8, 1.0, %v2490_v63  ;;  %vm612_vm8 = vcmp.eq.s32.totalorder %v2787_v60, %v2701_v30 }
  0xce   : > { %1025 = vperm.xlu1 %2388, %v2604_v15   ;;  %v2798_v3 = vpop.permute.xlu0 %483  ;;  %v445_v59 = vadd.f32 %v2068_v13, %v2802_v4 }
  0xcf   : > { %vm510_vm13 = vcmp.eq.s32.totalorder %v2787_v60, %v2798_v3 }
  0xd0   : > { %2421 = vset.pattern.permute.xlu0 %v2482_v0  ;;  %v2805_v5 = vpop.permute.xlu1 %465 }
  0xd1   : > { %1155 = vperm.xlu0 %2421, %v2589_v11  }
  0xd2   : > { %1028 = vperm.xlu1 %2388, %v2576_v8   ;;  %v493_v34 = vpop.permute.xlu0 %492 }
  0xd3   : > { %vm513_vm3 = vcmp.eq.s32.totalorder %v2787_v60, %v493_v34  ;;  %v2081_v34 = vsel %vm506_vm9, 1.0, %v2490_v63 }
  0xd4   : > { %v2088_v37 = vsel %vm513_vm3, 1.0, %v2490_v63 }
  0xd5   : > { %v2816_v41 = vadd.f32 %v2088_v37, %v449_v6  ;;  %v2818_v42 = vpop.permute.xlu1 %901  ;;  %1161 = vperm.xlu0 %2421, %v2744_v44  }
  0xd6   : > { %2389 = vset.pattern.permute.xlu1 %v2485_v9  ;;  %v496_v11 = vpop.permute.xlu0 %495 }
  0xd7   : > { %vm514_vm5 = vcmp.eq.s32.totalorder %v2787_v60, %v496_v11  ;;  %598 = vperm.xlu1 %2389, %v2704_v31  }
  0xd8   : > { %v2089_v29 = vsel %vm514_vm5, 1.0, %v2490_v63 }
  0xd9   : > { %v2829_v46 = vadd.f32 %v2089_v29, %v450_v39  ;;  %v2831_v50 = vpop.permute.xlu1 %904  ;;  %1170 = vperm.xlu0 %2421, %v2755_v48   ;;  %v554_v39 = vadd.f32 %v2081_v34, %v442_v32  ;;  %v2084_v29 = vsel %vm509_vm11, 1.0, %v2490_v63  ;;  %vm836_vm11 = vcmp.eq.s32.totalorder %v2787_v60, %v2764_v51 }
  0xda   : > { %v557_v57 = vadd.f32 %v2084_v29, %v445_v59 }
  0xdb   : > { %v2837_v2 = vpop.permute.xlu0 %568  ;;  %2390 = vset.pattern.permute.xlu1 %v2489_v19 }
  0xdc   : > { %1034 = vperm.xlu1 %2390, %v2616_v17   ;;  %vm613_vm7 = vcmp.eq.s32.totalorder %v2787_v60, %v2837_v2 }
  0xdd   : > { %v2092_v25 = vsel %vm613_vm7, 1.0, %v2490_v63 }
  0xde   : > { %v2845_v6 = vpop.permute.xlu1 %474 }
  0xdf   : > { %v581_v37 = vpop.permute.xlu0 %580 }
  0xe0   : > { %vm617_vm12 = vcmp.eq.s32.totalorder %v2787_v60, %v581_v37  ;;  %2391 = vset.pattern.permute.xlu1 %v2486_v12 }
  0xe1   : > { %v2096_v35 = vsel %vm617_vm12, 1.0, %v2490_v63  ;;  %701 = vperm.xlu1 %2391, %v2680_v24   ;;  %vm837_vm12 = vcmp.eq.s32.totalorder %v2787_v60, %v2775_v54 }
  0xe2   : > { %v2857_v11 = vadd.f32 %v2096_v35, %v553_v55  ;;  %v2085_v55 = vsel %vm510_vm13, 1.0, %v2490_v63 }
  0xe3   : > { %v2861_v38 = vpop.permute.xlu1 %910  ;;  %v584_v61 = vpop.permute.xlu0 %583  ;;  %v558_v37 = vadd.f32 %v2085_v55, %v446_v56  ;;  %v2060_v56 = vsel %vm389_vm2, 1.0, %v2490_v63  ;;  %v2075_v55 = vsel %vm500_vm4, 1.0, %v2490_v63 }
  0xe4   : > { %vm618_vm14 = vcmp.eq.s32.totalorder %v2787_v60, %v584_v61  ;;  %v437_v49 = vadd.f32 %v2060_v56, %v2802_v4 }
  0xe5   : > { %v2097_v53 = vsel %vm618_vm14, 1.0, %v2490_v63  ;;  %2392 = vset.pattern.permute.xlu1 %v2482_v0  ;;  %vm948_vm14 = vcmp.eq.s32.totalorder %v2787_v60, %v2818_v42 }
  0xe6   : > { %v2869_v32 = vadd.f32 %v2097_v53, %v554_v39  ;;  %1137 = vperm.xlu1 %2392, %v2604_v15   ;;  %v2139_v42 = vsel %vm948_vm14, 1.0, %v2490_v63  ;;  %vm390_vm14 = vcmp.eq.s32.totalorder %v2787_v60, %v2667_v20 }
  0xe7   : > { %v593_v13 = vpop.permute.xlu0 %592 }
  0xe8   : > { %vm621_vm15 = vcmp.eq.s32.totalorder %v2787_v60, %v593_v13  ;;  %v2874_v34 = vpop.permute.xlu1 %577 }
  0xe9   : > { %v2100_v3 = vsel %vm621_vm15, 1.0, %v2490_v63  ;;  %vm949_vm15 = vcmp.eq.s32.totalorder %v2787_v60, %v2831_v50 }
  0xea   : > { %v2877_v35 = vadd.f32 %v2100_v3, %v557_v57  ;;  %1140 = vperm.xlu1 %2392, %v2576_v8   ;;  %v2059_v8 = vsel %vm388_vm1, 1.0, %v2490_v63 }
  0xeb   : > { %v596_v45 = vpop.permute.xlu0 %595  ;;  %v436_v28 = vadd.f32 %v2059_v8, %v2802_v4 }
  0xec   : > { %vm622_vm0 = vcmp.eq.s32.totalorder %v2787_v60, %v596_v45  ;;  %v2076_v45 = vsel %vm501_vm6, 1.0, %v2490_v63 }
  0xed   : > { %v2101_v59 = vsel %vm622_vm0, 1.0, %v2490_v63  ;;  %v2882_v15 = vpop.permute.xlu1 %1013  ;;  %v549_v2 = vadd.f32 %v2076_v45, %v437_v49 }
  0xee   : > { %v2886_v39 = vadd.f32 %v2101_v59, %v558_v37  ;;  %2393 = vset.pattern.permute.xlu1 %v2486_v12  ;;  %vm1060_vm2 = vcmp.eq.s32.totalorder %v2787_v60, %v2882_v15 }
  0xef   : > { %710 = vperm.xlu1 %2393, %v2704_v31   ;;  %v605_v29 = vpop.permute.xlu0 %604  ;;  %v661_v30 = vadd.f32 %v2092_v25, %v549_v2 }
  0xf0   : > { %vm625_vm3 = vcmp.eq.s32.totalorder %v2787_v60, %v605_v29 }
  0xf1   : > { %v2104_v61 = vsel %vm625_vm3, 1.0, %v2490_v63  ;;  %v2895_v53 = vpop.permute.xlu1 %1016 }
  0xf2   : > { %v2900_v26 = vadd.f32 %v2104_v61, %v2816_v41  ;;  %vm1061_vm0 = vcmp.eq.s32.totalorder %v2787_v60, %v2895_v53 }
  0xf3   : > { %2395 = vset.pattern.permute.xlu1 %v2482_v0  ;;  %v608_v57 = vpop.permute.xlu0 %607  ;;  %v2156_v53 = vsel %vm1061_vm0, 1.0, %v2490_v63  ;;  %vm615_vm0 = vcmp.eq.s32.totalorder %v2787_v60, %v2719_v36 }
  0xf4   : > { %vm626_vm5 = vcmp.eq.s32.totalorder %v2787_v60, %v608_v57  ;;  %1146 = vperm.xlu1 %2395, %v2616_v17   ;;  %v548_v17 = vadd.f32 %v2075_v55, %v436_v28  ;;  %v2108_v57 = vsel %vm725_vm10, 1.0, %v2490_v63  ;;  %v2094_v36 = vsel %vm615_vm0, 1.0, %v2490_v63 }
  0xf5   : > { %v2105_v13 = vsel %vm626_vm5, 1.0, %v2490_v63  ;;  %v773_v28 = vadd.f32 %v2108_v57, %v661_v30 }
  0xf6   : > { %v2915_v41 = vadd.f32 %v2105_v13, %v2829_v46  ;;  %v2917_v3 = vpop.permute.xlu1 %586  ;;  %v2091_v46 = vsel %vm612_vm8, 1.0, %v2490_v63  ;;  %v2123_v13 = vsel %vm836_vm11, 1.0, %v2490_v63 }
  0xf7   : > { %v660_v8 = vadd.f32 %v2091_v46, %v548_v17  ;;  %v2124_v17 = vsel %vm837_vm12, 1.0, %v2490_v63  ;;  %vm391_vm12 = vcmp.eq.s32.totalorder %v2787_v60, %v2673_v22 }
  0xf8   : > { %v678_v37 = vpop.permute.xlu0 %677  ;;  %2396 = vset.pattern.permute.xlu1 %v2483_v1 }
  0xf9   : > { %vm724_vm9 = vcmp.eq.s32.totalorder %v2787_v60, %v678_v37  ;;  %377 = vperm.xlu1 %2396, %v2744_v44   ;;  %v885_v37 = vadd.f32 %v2124_v17, %v773_v28 }
  0xfa   : > { %v2107_v59 = vsel %vm724_vm9, 1.0, %v2490_v63 }
  0xfb   : > { %v2928_v29 = vpop.permute.xlu1 %1022  ;;  %v772_v56 = vadd.f32 %v2107_v59, %v660_v8  ;;  %v2155_v8 = vsel %vm1060_vm2, 1.0, %v2490_v63  ;;  %vm502_vm2 = vcmp.eq.s32.totalorder %v2787_v60, %v2690_v27 }
  0xfc   : > { %v2932_v61 = vpop.permute.xlu0 %686 }
  0xfd   : > { %2397 = vset.pattern.permute.xlu1 %v2487_v16  ;;  %v884_v51 = vadd.f32 %v2123_v13, %v772_v56 }
  0xfe   : > { %813 = vperm.xlu1 %2397, %v2680_v24  }
  0xff   : > { %v996_v50 = vadd.f32 %v2139_v42, %v884_v51 }
 0x100   : > { %v2941_v55 = vpop.permute.xlu1 %689  ;;  %v693_v40 = vpop.permute.xlu0 %692 }
 0x101   : > { %vm729_vm13 = vcmp.eq.s32.totalorder %v2787_v60, %v693_v40  ;;  %v1108_v28 = vadd.f32 %v2155_v8, %v996_v50 }
 0x102   : > { %v2112_v49 = vsel %vm729_vm13, 1.0, %v2490_v63  ;;  %816 = vperm.xlu1 %2397, %v2584_v10   ;;  %vm503_vm13 = vcmp.eq.s32.totalorder %v2787_v60, %v2766_v52 }
 0x103   : > { %v2951_v54 = vadd.f32 %v2112_v49, %v2857_v11  ;;  %v2140_v11 = vsel %vm949_vm15, 1.0, %v2490_v63 }
 0x104   : > { %v696_v45 = vpop.permute.xlu0 %695  ;;  %v997_v59 = vadd.f32 %v2140_v11, %v885_v37 }
 0x105   : > { %vm730_vm1 = vcmp.eq.s32.totalorder %v2787_v60, %v696_v45  ;;  %v1126_v25 = vpop.permute.xlu1 %1125 }
 0x106   : > { %v2113_v2 = vsel %vm730_vm1, 1.0, %v2490_v63  ;;  %vm1172_vm3 = vcmp.eq.s32.totalorder %v2787_v60, %v1126_v25  ;;  %2399 = vset.pattern.permute.xlu1 %v2483_v1  ;;  %v1109_v57 = vadd.f32 %v2156_v53, %v997_v59  ;;  %vm727_vm1 = vcmp.eq.s32.totalorder %v2787_v60, %v2932_v61 }
 0x107   : > { %v778_v46 = vadd.f32 %v2113_v2, %v2869_v32  ;;  %386 = vperm.xlu1 %2399, %v2755_v48   ;;  %v2171_v15 = vsel %vm1172_vm3, 1.0, %v2490_v63 }
 0x108   : > { %v705_v30 = vpop.permute.xlu0 %704  ;;  %v1220_v51 = vadd.f32 %v2171_v15, %v1108_v28 }
 0x109   : > { %vm733_vm4 = vcmp.eq.s32.totalorder %v2787_v60, %v705_v30  ;;  %v1129_v56 = vpop.permute.xlu1 %1128 }
 0x10a   : > { %v2116_v1 = vsel %vm733_vm4, 1.0, %v2490_v63  ;;  %vm1173_vm5 = vcmp.eq.s32.totalorder %v2787_v60, %v1129_v56  ;;  %vm614_vm4 = vcmp.eq.s32.totalorder %v2787_v60, %v2710_v33 }
 0x10b   : > { %v2974_v40 = vadd.f32 %v2116_v1, %v2877_v35  ;;  %v2172_v32 = vsel %vm1173_vm5, 1.0, %v2490_v63  ;;  %2400 = vset.pattern.permute.xlu1 %v2487_v16  ;;  %vm726_vm5 = vcmp.eq.s32.totalorder %v2787_v60, %v2741_v43 }
 0x10c   : > { %822 = vperm.xlu1 %2400, %v2704_v31   ;;  %v708_v13 = vpop.permute.xlu0 %707  ;;  %v1221_v49 = vadd.f32 %v2172_v32, %v1109_v57 }
 0x10d   : > { %vm734_vm6 = vcmp.eq.s32.totalorder %v2787_v60, %v708_v13 }
 0x10e   : > { %v2117_v17 = vsel %vm734_vm6, 1.0, %v2490_v63  ;;  %v2981_v37 = vpop.permute.xlu1 %698  ;;  %v1236_v45 = vpack.c.bf16 %v1221_v49, %v1220_v51  ;;  %v2062_v49 = vsel %vm391_vm12, 1.0, %v2490_v63  ;;  %vm839_vm6 = vcmp.eq.s32.totalorder %v2787_v60, %v2791_v62 }
 0x10f   : > { %v782_v42 = vadd.f32 %v2117_v17, %v2886_v39  ;;  %v439_v22 = vadd.f32 %v2062_v49, %v2802_v4  ;;  %v2126_v43 = vsel %vm839_vm6, 1.0, %v2490_v63  ;;  %vm1174_vm12 = vcmp.eq.s32.totalorder %v2787_v60, %v2669_v21 }
 0x110   : > { %2401 = vset.pattern.permute.xlu1 %v2484_v7  ;;  %2272 = vmatprep.mubr.bf16.mxu0 %v1236_v45  ;;  %v717_v35 = vpop.permute.xlu0 %716  ;;  %v2078_v45 = vsel %vm503_vm13, 1.0, %v2490_v63 }
 0x111   : > { %vm737_vm7 = vcmp.eq.s32.totalorder %v2787_v60, %v717_v35  ;;  %489 = vperm.xlu1 %2401, %v2744_v44   ;;  %v551_v52 = vadd.f32 %v2078_v45, %v439_v22 }
 0x112   : > { %v2120_v25 = vsel %vm737_vm7, 1.0, %v2490_v63 }
 0x113   : > { %v785_v2 = vadd.f32 %v2120_v25, %v2900_v26  ;;  %v2989_v50 = vpop.permute.xlu1 %1134  ;;  %v663_v61 = vadd.f32 %v2094_v36, %v551_v52 }
 0x114   : > { %v720_v11 = vpop.permute.xlu0 %719 }
 0x115   : > { %vm738_vm8 = vcmp.eq.s32.totalorder %v2787_v60, %v720_v11  ;;  %2402 = vset.pattern.permute.xlu1 %v2488_v18  ;;  %v2061_v11 = vsel %vm390_vm14, 1.0, %v2490_v63 }
 0x116   : > { %v2121_v39 = vsel %vm738_vm8, 1.0, %v2490_v63  ;;  %925 = vperm.xlu1 %2402, %v2680_v24   ;;  %vm951_vm8 = vcmp.eq.s32.totalorder %v2787_v60, %v2861_v38 }
 0x117   : > { %v2996_v53 = vadd.f32 %v2121_v39, %v2915_v41  ;;  %v2110_v39 = vsel %vm727_vm1, 1.0, %v2490_v63  ;;  %vm504_vm1 = vcmp.eq.s32.totalorder %v2787_v60, %v2805_v5 }
 0x118   : > { %v2998_v59 = vpop.permute.xlu1 %365 }
 0x119   : > { %v3000_v30 = vpop.permute.xlu0 %795  ;;  %vm396_vm14 = vcmp.eq.s32.totalorder %v2787_v60, %v2998_v59 }
 0x11a   : > { %928 = vperm.xlu1 %2402, %v2584_v10   ;;  %vm838_vm7 = vcmp.eq.s32.totalorder %v2787_v60, %v3000_v30 }
 0x11b   : > { %v2125_v22 = vsel %vm838_vm7, 1.0, %v2490_v63 }
 0x11d   : > { %v3003_v26 = vpop.permute.xlu1 %801  ;;  %v808_v8 = vpop.permute.xlu0 %807 }
 0x11e   : > { %vm842_vm9 = vcmp.eq.s32.totalorder %v2787_v60, %v808_v8  ;;  %2404 = vset.pattern.permute.xlu1 %v2484_v7  ;;  %vm840_vm6 = vcmp.eq.s32.totalorder %v2787_v60, %v3003_v26 }
 0x11f   : > { %v2129_v15 = vsel %vm842_vm9, 1.0, %v2490_v63  ;;  %498 = vperm.xlu1 %2404, %v2755_v48  }
 0x120   : > { %v890_v56 = vadd.f32 %v2129_v15, %v778_v46  ;;  %v2077_v15 = vsel %vm502_vm2, 1.0, %v2490_v63 }
 0x121   : > { %v3009_v41 = vpop.permute.xlu1 %804  ;;  %v820_v57 = vpop.permute.xlu0 %819 }
 0x122   : > { %vm846_vm10 = vcmp.eq.s32.totalorder %v2787_v60, %v820_v57  ;;  %v438_v57 = vadd.f32 %v2061_v11, %v2802_v4  ;;  %vm841_vm7 = vcmp.eq.s32.totalorder %v2787_v60, %v3009_v41 }
 0x123   : > { %v2133_v1 = vsel %vm846_vm10, 1.0, %v2490_v63  ;;  %2405 = vset.pattern.permute.xlu1 %v2488_v18  ;;  %vm1063_vm10 = vcmp.eq.s32.totalorder %v2787_v60, %v2928_v29  ;;  %v2128_v41 = vsel %vm841_vm7, 1.0, %v2490_v63 }
 0x124   : > { %v894_v28 = vadd.f32 %v2133_v1, %v782_v42  ;;  %934 = vperm.xlu1 %2405, %v2704_v31   ;;  %v775_v1 = vadd.f32 %v2110_v39, %v663_v61  ;;  %v2158_v36 = vsel %vm1063_vm10, 1.0, %v2490_v63 }
 0x125   : > { %v829_v32 = vpop.permute.xlu0 %828 }
 0x126   : > { %vm849_vm11 = vcmp.eq.s32.totalorder %v2787_v60, %v829_v32  ;;  %v3016_v7 = vpop.permute.xlu1 %374  ;;  %v2093_v32 = vsel %vm614_vm4, 1.0, %v2490_v63  ;;  %vm395_vm4 = vcmp.eq.s32.totalorder %v2787_v60, %v2783_v58 }
 0x127   : > { %v2136_v13 = vsel %vm849_vm11, 1.0, %v2490_v63  ;;  %vm1175_vm11 = vcmp.eq.s32.totalorder %v2787_v60, %v2989_v50 }
 0x128   : > { %v3021_v46 = vadd.f32 %v2136_v13, %v785_v2  ;;  %2406 = vset.pattern.permute.xlu1 %v2485_v9  ;;  %v2109_v13 = vsel %vm726_vm5, 1.0, %v2490_v63  ;;  %v2174_v29 = vsel %vm1175_vm11, 1.0, %v2490_v63  ;;  %vm728_vm5 = vcmp.eq.s32.totalorder %v2787_v60, %v2941_v55 }
 0x129   : > { %601 = vperm.xlu1 %2406, %v2744_v44   ;;  %v2111_v58 = vsel %vm728_vm5, 1.0, %v2490_v63 }
 0x12a   : > { %v908_v51 = vpop.permute.xlu0 %907 }
 0x12b   : > { %v3028_v17 = vpop.permute.xlu1 %810  ;;  %vm950_vm9 = vcmp.eq.s32.totalorder %v2787_v60, %v908_v51 }
 0x12c   : > { %v2141_v52 = vsel %vm950_vm9, 1.0, %v2490_v63 }
 0x12d   : > { %2407 = vset.pattern.permute.xlu1 %v2489_v19 }
 0x12e   : > { %1037 = vperm.xlu1 %2407, %v2680_v24   ;;  %v920_v42 = vpop.permute.xlu0 %919 }
 0x12f   : > { %vm954_vm15 = vcmp.eq.s32.totalorder %v2787_v60, %v920_v42  ;;  %v2142_v42 = vsel %vm951_vm8, 1.0, %v2490_v63  ;;  %vm507_vm8 = vcmp.eq.s32.totalorder %v2787_v60, %v2845_v6  ;;  %v2127_v6 = vsel %vm840_vm6, 1.0, %v2490_v63 }
 0x130   : > { %v2145_v35 = vsel %vm954_vm15, 1.0, %v2490_v63  ;;  %v3042_v25 = vpop.permute.xlu1 %477  ;;  %vm392_vm15 = vcmp.eq.s32.totalorder %v2787_v60, %v2752_v47 }
 0x131   : > { %v3044_v2 = vadd.f32 %v2145_v35, %v890_v56  ;;  %vm508_vm0 = vcmp.eq.s32.totalorder %v2787_v60, %v3042_v25 }
 0x132   : > { %1040 = vperm.xlu1 %2407, %v2584_v10   ;;  %v932_v20 = vpop.permute.xlu0 %931 }
 0x133   : > { %vm958_vm3 = vcmp.eq.s32.totalorder %v2787_v60, %v932_v20 }
 0x134   : > { %v2149_v8 = vsel %vm958_vm3, 1.0, %v2490_v63  ;;  %vm616_vm3 = vcmp.eq.s32.totalorder %v2787_v60, %v2874_v34 }
 0x135   : > { %v3057_v27 = vadd.f32 %v2149_v8, %v894_v28  ;;  %v3059_v56 = vpop.permute.xlu1 %913  ;;  %v550_v28 = vadd.f32 %v2077_v15, %v438_v57  ;;  %v2173_v8 = vsel %vm1174_vm12, 1.0, %v2490_v63  ;;  %v2095_v34 = vsel %vm616_vm3, 1.0, %v2490_v63 }
 0x136   : > { %2409 = vset.pattern.permute.xlu1 %v2485_v9  ;;  %v3067_v33 = vpop.permute.xlu0 %937  ;;  %v887_v9 = vadd.f32 %v2126_v43, %v775_v1  ;;  %vm952_vm10 = vcmp.eq.s32.totalorder %v2787_v60, %v3059_v56  ;;  %vm619_vm12 = vcmp.eq.s32.totalorder %v2787_v60, %v2917_v3  ;;  %vm843_vm3 = vcmp.eq.s32.totalorder %v2787_v60, %v3028_v17 }
 0x137   : > { %610 = vperm.xlu1 %2409, %v2755_v48   ;;  %v662_v62 = vadd.f32 %v2093_v32, %v550_v28  ;;  %v2143_v3 = vsel %vm952_vm10, 1.0, %v2490_v63  ;;  %vm1178_vm10 = vcmp.eq.s32.totalorder %v2787_v60, %v2676_v23 }
 0x138   : > { %v999_v38 = vadd.f32 %v2142_v42, %v887_v9  ;;  %v2082_v42 = vsel %vm507_vm8, 1.0, %v2490_v63 }
 0x139   : > { %v3075_v49 = vpop.permute.xlu1 %916  ;;  %v774_v30 = vadd.f32 %v2109_v13, %v662_v62  ;;  %v2066_v62 = vsel %vm395_vm4, 1.0, %v2490_v63 }
 0x13a   : > { %v3080_v45 = vpop.permute.xlu0 %946  ;;  %v1111_v50 = vadd.f32 %v2158_v36, %v999_v38  ;;  %vm953_vm11 = vcmp.eq.s32.totalorder %v2787_v60, %v3075_v49  ;;  %v443_v56 = vadd.f32 %v2066_v62, %v2802_v4  ;;  %v2472_v36 = vld [vmem:[%s2548_s30 + $0x68] sm:$0xff] }
 0x13b   : > { %2410 = vset.pattern.permute.xlu1 %v2489_v19  ;;  %v886_v51 = vadd.f32 %v2125_v22, %v774_v30  ;;  %v2144_v49 = vsel %vm953_vm11, 1.0, %v2490_v63 }
 0x13c   : > { %1046 = vperm.xlu1 %2410, %v2704_v31   ;;  %v1223_v21 = vadd.f32 %v2174_v29, %v1111_v50  ;;  %v555_v29 = vadd.f32 %v2082_v42, %v443_v56  ;;  %v2431_v56 = vld [vmem:[%s3523_s3] sm:$0xff]  }
 0x13d   : > { %v998_v11 = vadd.f32 %v2141_v52, %v886_v51  ;;  %v2098_v51 = vsel %vm619_vm12, 1.0, %v2490_v63  ;;  %2288 = vmatprep.subr.bf16.mxu1 %v2431_v56 }
 0x13e   : > { %v3091_v35 = vpop.permute.xlu1 %486  ;;  %2289 = vmatpush3.bf16.msra.mxu1 %v2431_v56 }
 0x13f   : > { %v1020_v20 = vpop.permute.xlu0 %1019 }
 0x140   : > { %vm1062_vm13 = vcmp.eq.s32.totalorder %v2787_v60, %v1020_v20  ;;  %2411 = vset.pattern.permute.xlu1 %v2486_v12 }
 0x141   : > { %v2157_v39 = vsel %vm1062_vm13, 1.0, %v2490_v63  ;;  %713 = vperm.xlu1 %2411, %v2744_v44  }
 0x142   : > { %v1110_v61 = vadd.f32 %v2157_v39, %v998_v11  ;;  %v889_v11 = vadd.f32 %v2128_v41, %v2951_v54 }
 0x143   : > { %v3102_v15 = vpop.permute.xlu1 %922 }
 0x144   : > { %v1222_v57 = vadd.f32 %v2173_v8, %v1110_v61  ;;  %v1001_v50 = vadd.f32 %v2144_v49, %v889_v11  ;;  %v1032_v61 = vpop.permute.xlu0 %1031  ;;  %v667_v8 = vadd.f32 %v2098_v51, %v555_v29  ;;  %vm955_vm7 = vcmp.eq.s32.totalorder %v2787_v60, %v3102_v15  ;;  %v2433_v49 = vld [vmem:[%s3523_s3 + $0x10] sm:$0xff]  }
 0x145   : > { %2412 = vset.pattern.permute.xlu1 %v2482_v0  ;;  %vm1066_vm6 = vcmp.eq.s32.totalorder %v2787_v60, %v1032_v61 }
 0x146   : > { %1149 = vperm.xlu1 %2412, %v2680_v24   ;;  %v1237_v1 = vpack.c.bf16 %v1223_v21, %v1222_v57  ;;  %v2161_v15 = vsel %vm1066_vm6, 1.0, %v2490_v63 }
 0x148   : > { %2273 = vmatmul.mubr.bf16.vlgmr.msra.gmra.mrb[0].mxu0 %v1237_v1  ;;  %v590_v32 = vpop.permute.xlu1 %589 }
 0x149   : > { %vm620_vm2 = vcmp.eq.s32.totalorder %v2787_v60, %v590_v32 }
 0x14a   : > { %1152 = vperm.xlu1 %2412, %v2584_v10   ;;  %v2067_v10 = vsel %vm396_vm14, 1.0, %v2490_v63  ;;  %v2099_v59 = vsel %vm620_vm2, 1.0, %v2490_v63  ;;  %vm731_vm2 = vcmp.eq.s32.totalorder %v2787_v60, %v2981_v37 }
 0x14b   : > { %v444_v47 = vadd.f32 %v2067_v10, %v2802_v4 }
 0x14d   : > { %v3107_v28 = vpop.permute.xlu1 %1025 }
 0x14e   : > { %2414 = vset.pattern.permute.xlu1 %v2486_v12  ;;  %v2063_v12 = vsel %vm392_vm15, 1.0, %v2490_v63  ;;  %vm1064_vm13 = vcmp.eq.s32.totalorder %v2787_v60, %v3107_v28  ;;  %vm399_vm15 = vcmp.eq.s32.totalorder %v2787_v60, %v3016_v7  ;;  %v2473_v7 = vld [vmem:[%s2548_s30 + $0x70] sm:$0xff] }
 0x14f   : > { %722 = vperm.xlu1 %2414, %v2755_v48   ;;  %v440_v5 = vadd.f32 %v2063_v12, %v2802_v4  ;;  %v2159_v39 = vsel %vm1064_vm13, 1.0, %v2490_v63  ;;  %v2070_v54 = vsel %vm399_vm15, 1.0, %v2490_v63 }
 0x150   : > { %v447_v10 = vadd.f32 %v2070_v54, %v2802_v4 }
 0x151   : > { %v3111_v13 = vpop.permute.xlu1 %1028 }
 0x152   : > { %vm1065_vm14 = vcmp.eq.s32.totalorder %v2787_v60, %v3111_v13  ;;  %v2114_v13 = vsel %vm731_vm2, 1.0, %v2490_v63 }
 0x153   : > { %2415 = vset.pattern.permute.xlu1 %v2482_v0 }
 0x154   : > { %1158 = vperm.xlu1 %2415, %v2704_v31   ;;  %v2079_v31 = vsel %vm504_vm1, 1.0, %v2490_v63  ;;  %vm511_vm1 = vcmp.eq.s32.totalorder %v2787_v60, %v3091_v35 }
 0x155   : > { %v552_v9 = vadd.f32 %v2079_v31, %v440_v5  ;;  %v2086_v1 = vsel %vm511_vm1, 1.0, %v2490_v63  ;;  %v779_v5 = vadd.f32 %v2114_v13, %v667_v8 }
 0x156   : > { %v3115_v43 = vpop.permute.xlu1 %598  ;;  %v559_v37 = vadd.f32 %v2086_v1, %v447_v10 }
 0x157   : > { %v664_v22 = vadd.f32 %v2095_v34, %v552_v9  ;;  %vm623_vm4 = vcmp.eq.s32.totalorder %v2787_v60, %v3115_v43 }
 0x158   : > { %2416 = vset.pattern.permute.xlu1 %v2487_v16  ;;  %v2083_v16 = vsel %vm508_vm0, 1.0, %v2490_v63  ;;  %v2102_v12 = vsel %vm623_vm4, 1.0, %v2490_v63 }
 0x159   : > { %825 = vperm.xlu1 %2416, %v2744_v44   ;;  %v556_v25 = vadd.f32 %v2083_v16, %v444_v47  ;;  %v776_v52 = vadd.f32 %v2111_v58, %v664_v22  ;;  %v2130_v47 = vsel %vm843_vm3, 1.0, %v2490_v63  ;;  %v671_v62 = vadd.f32 %v2102_v12, %v559_v37 }
 0x15a   : > { %v891_v17 = vadd.f32 %v2130_v47, %v779_v5  ;;  %v1044_v47 = vpop.permute.xlu0 %1043 }
 0x15b   : > { %v3130_v24 = vpop.permute.xlu1 %1034  ;;  %v668_v55 = vadd.f32 %v2099_v59, %v556_v25  ;;  %v888_v20 = vadd.f32 %v2127_v6, %v776_v52  ;;  %v2146_v25 = vsel %vm955_vm7, 1.0, %v2490_v63 }
 0x15c   : > { %vm1067_vm8 = vcmp.eq.s32.totalorder %v2787_v60, %v3130_v24  ;;  %v1003_v58 = vadd.f32 %v2146_v25, %v891_v17 }
 0x15d   : > { %831 = vperm.xlu1 %2416, %v2599_v14   ;;  %v1000_v35 = vadd.f32 %v2143_v3, %v888_v20  ;;  %v2435_v20 = vld [vmem:[%s3523_s3 + $0x20] sm:$0xff]  }
 0x15e   : > { %v3295_v17 = vpop.permute.xlu0 %1052 }
 0x15f   : > { %v1112_v32 = vadd.f32 %v2159_v39, %v1000_v35  ;;  %v2436_v39 = vld [vmem:[%s3523_s3 + $0x28] sm:$0xff]  }
 0x160   : > { %v702_v14 = vpop.permute.xlu1 %701 }
 0x161   : > { %vm732_vm9 = vcmp.eq.s32.totalorder %v2787_v60, %v702_v14  ;;  %834 = vperm.xlu1 %2416, %v2755_v48   ;;  %v2162_v14 = vsel %vm1067_vm8, 1.0, %v2490_v63 }
 0x162   : > { %v2115_v26 = vsel %vm732_vm9, 1.0, %v2490_v63  ;;  %v1115_v22 = vadd.f32 %v2162_v14, %v1003_v58 }
 0x163   : > { %v3164_v30 = vadd.f32 %v2115_v26, %v668_v55 }
 0x165   : > { %2418 = vset.pattern.permute.xlu1 %v2488_v18  ;;  %v1138_v38 = vpop.permute.xlu1 %1137  ;;  %v2160_v18 = vsel %vm1065_vm14, 1.0, %v2490_v63 }
 0x166   : > { %vm1176_vm0 = vcmp.eq.s32.totalorder %v2787_v60, %v1138_v38  ;;  %940 = vperm.xlu1 %2418, %v2472_v36   ;;  %v1113_v28 = vadd.f32 %v2160_v18, %v1001_v50  ;;  %v2437_v50 = vld [vmem:[%s3523_s3 + $0x30] sm:$0xff]  }
 0x167   : > { %v2175_v21 = vsel %vm1176_vm0, 1.0, %v2490_v63 }
 0x168   : > { %v1224_v16 = vadd.f32 %v2175_v21, %v1112_v32  ;;  %v2438_v21 = vld [vmem:[%s3523_s3 + $0x38] sm:$0xff]  }
 0x169   : > { %v1141_v57 = vpop.permute.xlu1 %1140 }
 0x16a   : > { %vm1177_vm5 = vcmp.eq.s32.totalorder %v2787_v60, %v1141_v57  ;;  %943 = vperm.xlu1 %2418, %v2473_v7  }
 0x16b   : > { %v2176_v43 = vsel %vm1177_vm5, 1.0, %v2490_v63 }
 0x16c   : > { %v1225_v31 = vadd.f32 %v2176_v43, %v1113_v28 }
 0x16e   : > { %2420 = vset.pattern.permute.xlu1 %v2489_v19  ;;  %v711_v59 = vpop.permute.xlu1 %710  ;;  %v1238_v34 = vpack.c.bf16 %v1225_v31, %v1224_v16  ;;  %v1114_v19 = vadd.f32 %v2161_v15, %v3044_v2 }
 0x16f   : > { %vm735_vm9 = vcmp.eq.s32.totalorder %v2787_v60, %v711_v59  ;;  %1049 = vperm.xlu1 %2420, %v2744_v44   ;;  %v2177_v44 = vsel %vm1178_vm10, 1.0, %v2490_v63 }
 0x170   : > { %v2118_v9 = vsel %vm735_vm9, 1.0, %v2490_v63  ;;  %2276 = vmatprep.mubr.bf16.mxu0 %v1238_v34  ;;  %v1226_v6 = vadd.f32 %v2177_v44, %v1114_v19 }
 0x171   : > { %v3228_v24 = vadd.f32 %v2118_v9, %v671_v62 }
 0x173   : > { %1055 = vperm.xlu1 %2420, %v2473_v7   ;;  %v1147_v55 = vpop.permute.xlu1 %1146 }
 0x174   : > { %vm1179_vm11 = vcmp.eq.s32.totalorder %v2787_v60, %v1147_v55 }
 0x175   : > { %v2178_v26 = vsel %vm1179_vm11, 1.0, %v2490_v63  ;;  %vm1070_vm11 = vcmp.eq.s32.totalorder %v2787_v60, %v1044_v47 }
 0x176   : > { %v1227_v41 = vadd.f32 %v2178_v26, %v1115_v22 }
 0x177   : > { %1058 = vperm.xlu1 %2420, %v2755_v48   ;;  %v2432_v48 = vld [vmem:[%s3523_s3 + $0x8] sm:$0xff]  }
 0x178   : > { %v378_v42 = vpop.permute.xlu1 %377  ;;  %v1239_v52 = vpack.c.bf16 %v1227_v41, %v1226_v6  ;;  %2290 = vmatprep.subr.bf16.mxu1 %v2432_v48  ;;  %v1156_v41 = vpop.permute.xlu0 %1155 }
 0x179   : > { %2291 = vmatpush3.bf16.msra.mxu1 %v2432_v48  ;;  %vm400_vm12 = vcmp.eq.s32.totalorder %v2787_v60, %v378_v42 }
 0x17a   : > { %2277 = vmatmul.mubr.bf16.gmra.mrb[4].mxu0 %v1239_v52  ;;  %2292 = vmatprep.subr.bf16.mxu1 %v2433_v49  ;;  %v2071_v51 = vsel %vm400_vm12, 1.0, %v2490_v63 }
 0x17b   : > { %2422 = vset.pattern.permute.xlu1 %v2482_v0  ;;  %v2434_v0 = vld [vmem:[%s3523_s3 + $0x18] sm:$0xff]  }
 0x17c   : > { %1164 = vperm.xlu1 %2422, %v2472_v36   ;;  %v448_v36 = vadd.f32 %v2071_v51, %v2802_v4 }
 0x17d   : > { %v814_v23 = vpop.permute.xlu1 %813  ;;  %2293 = vmatpush3.bf16.msra.mxu1 %v2433_v49 }
 0x17e   : > { %2294 = vmatprep.subr.bf16.mxu1 %v2434_v0  ;;  %vm844_vm1 = vcmp.eq.s32.totalorder %v2787_v60, %v814_v23 }
 0x17f   : > { %v2131_v37 = vsel %vm844_vm1, 1.0, %v2490_v63 }
 0x180   : > { %1167 = vperm.xlu1 %2422, %v2473_v7   ;;  %v892_v25 = vadd.f32 %v2131_v37, %v3164_v30 }
 0x181   : > { %v817_v2 = vpop.permute.xlu1 %816  ;;  %2295 = vmatpush3.bf16.msra.mxu1 %v2434_v0 }
 0x182   : > { %2296 = vmatprep.subr.bf16.mxu1 %v2435_v20  ;;  %vm845_vm2 = vcmp.eq.s32.totalorder %v2787_v60, %v817_v2 }
 0x183   : > { %v2132_v5 = vsel %vm845_vm2, 1.0, %v2490_v63 }
 0x184   : > { %v893_v62 = vadd.f32 %v2132_v5, %v2974_v40 }
 0x185   : > { %2297 = vmatpush3.bf16.msra.mxu1 %v2435_v20 }
 0x186   : > { %v387_v3 = vpop.permute.xlu1 %386  ;;  %2298 = vmatprep.subr.bf16.mxu1 %v2436_v39 }
 0x187   : > { %vm403_vm14 = vcmp.eq.s32.totalorder %v2787_v60, %v387_v3  ;;  %v2165_v3 = vsel %vm1070_vm11, 1.0, %v2490_v63 }
 0x188   : > { %v2074_v61 = vsel %vm403_vm14, 1.0, %v2490_v63  ;;  %v1118_v51 = vadd.f32 %v2165_v3, %v3057_v27 }
 0x189   : > { %2299 = vmatpush3.bf16.msra.mxu1 %v2436_v39  ;;  %v451_v57 = vadd.f32 %v2074_v61, %v2802_v4 }
 0x18a   : > { %2300 = vmatprep.subr.bf16.mxu1 %v2437_v50 }
 0x18b   : > { %v3251_v38 = vpop.permute.xlu1 %822 }
 0x18c   : > { %vm847_vm8 = vcmp.eq.s32.totalorder %v2787_v60, %v3251_v38 }
 0x18d   : > { %2301 = vmatpush3.bf16.msra.mxu1 %v2437_v50  ;;  %v2134_v42 = vsel %vm847_vm8, 1.0, %v2490_v63 }
 0x18e   : > { %2302 = vmatprep.subr.bf16.mxu1 %v2438_v21  ;;  %v895_v56 = vadd.f32 %v2134_v42, %v3228_v24 }
 0x190   : > { %v490_v11 = vpop.permute.xlu1 %489 }
 0x191   : > { %vm512_vm13 = vcmp.eq.s32.totalorder %v2787_v60, %v490_v11  ;;  %2303 = vmatpush3.bf16.msra.mxu1 %v2438_v21 }
 0x192   : > { %v2087_v29 = vsel %vm512_vm13, 1.0, %v2490_v63  ;;  %vm1182_vm13 = vcmp.eq.s32.totalorder %v2787_v60, %v1156_v41 }
 0x193   : > { %v560_v18 = vadd.f32 %v2087_v29, %v448_v36  ;;  %v2181_v0 = vsel %vm1182_vm13, 1.0, %v2490_v63 }
 0x194   : > { %v1230_v36 = vadd.f32 %v2181_v0, %v1118_v51 }
 0x195   : > { %v926_v54 = vpop.permute.xlu1 %925 }
 0x196   : > { %vm956_vm3 = vcmp.eq.s32.totalorder %v2787_v60, %v926_v54 }
 0x197   : > { %v2147_v59 = vsel %vm956_vm3, 1.0, %v2490_v63 }
 0x198   : > { %v1004_v19 = vadd.f32 %v2147_v59, %v892_v25 }
 0x199   : > { %v929_v35 = vpop.permute.xlu1 %928 }
 0x19a   : > { %vm957_vm4 = vcmp.eq.s32.totalorder %v2787_v60, %v929_v35 }
 0x19b   : > { %v2148_v34 = vsel %vm957_vm4, 1.0, %v2490_v63  ;;  %vm963_vm4 = vcmp.eq.s32.totalorder %v2787_v60, %v3080_v45 }
 0x19c   : > { %v1005_v58 = vadd.f32 %v2148_v34, %v893_v62 }
 0x19e   : > { %v499_v8 = vpop.permute.xlu1 %498 }
 0x19f   : > { %vm515_vm15 = vcmp.eq.s32.totalorder %v2787_v60, %v499_v8 }
 0x1a0   : > { %v2090_v1 = vsel %vm515_vm15, 1.0, %v2490_v63 }
 0x1a1   : > { %v3274_v32 = vadd.f32 %v2090_v1, %v451_v57 }
 0x1a3   : > { %v935_v28 = vpop.permute.xlu1 %934 }
 0x1a4   : > { %vm959_vm10 = vcmp.eq.s32.totalorder %v2787_v60, %v935_v28 }
 0x1a5   : > { %v2150_v2 = vsel %vm959_vm10, 1.0, %v2490_v63 }
 0x1a6   : > { %v1007_v49 = vadd.f32 %v2150_v2, %v895_v56 }
 0x1a8   : > { %v602_v7 = vpop.permute.xlu1 %601 }
 0x1a9   : > { %vm624_vm0 = vcmp.eq.s32.totalorder %v2787_v60, %v602_v7 }
 0x1aa   : > { %v2103_v13 = vsel %vm624_vm0, 1.0, %v2490_v63  ;;  %vm960_vm0 = vcmp.eq.s32.totalorder %v2787_v60, %v3067_v33 }
 0x1ab   : > { %v3278_v10 = vadd.f32 %v2103_v13, %v560_v18  ;;  %v2151_v50 = vsel %vm960_vm0, 1.0, %v2490_v63 }
 0x1ad   : > { %v1038_v43 = vpop.permute.xlu1 %1037 }
 0x1ae   : > { %vm1068_vm5 = vcmp.eq.s32.totalorder %v2787_v60, %v1038_v43 }
 0x1af   : > { %v2163_v9 = vsel %vm1068_vm5, 1.0, %v2490_v63 }
 0x1b0   : > { %v1116_v44 = vadd.f32 %v2163_v9, %v1004_v19 }
 0x1b1   : > { %v1041_v12 = vpop.permute.xlu1 %1040 }
 0x1b2   : > { %vm1069_vm6 = vcmp.eq.s32.totalorder %v2787_v60, %v1041_v12 }
 0x1b3   : > { %v2164_v14 = vsel %vm1069_vm6, 1.0, %v2490_v63 }
 0x1b4   : > { %v1117_v30 = vadd.f32 %v2164_v14, %v1005_v58 }
 0x1b6   : > { %v3280_v16 = vpop.permute.xlu1 %610 }
 0x1b7   : > { %vm627_vm1 = vcmp.eq.s32.totalorder %v2787_v60, %v3280_v16 }
 0x1b8   : > { %v2106_v61 = vsel %vm627_vm1, 1.0, %v2490_v63  ;;  %vm1805_vm1 = vcmask 130048  }
 0x1b9   : > { %v675_v57 = vadd.f32 %v2106_v61, %v3274_v32  ;;  %v1162_v32 = vpop.permute.xlu0 %1161 }
 0x1ba   : > { %vm1184_vm11 = vcmp.eq.s32.totalorder %v2787_v60, %v1162_v32 }
 0x1bb   : > { %v1047_v4 = vpop.permute.xlu1 %1046 }
 0x1bc   : > { %vm1071_vm12 = vcmp.eq.s32.totalorder %v2787_v60, %v1047_v4 }
 0x1bd   : > { %v2166_v48 = vsel %vm1071_vm12, 1.0, %v2490_v63 }
 0x1be   : > { %v1119_v20 = vadd.f32 %v2166_v48, %v1007_v49 }
 0x1c0   : > { %v714_v31 = vpop.permute.xlu1 %713 }
 0x1c1   : > { %vm736_vm14 = vcmp.eq.s32.totalorder %v2787_v60, %v714_v31 }
 0x1c2   : > { %v2119_v24 = vsel %vm736_vm14, 1.0, %v2490_v63 }
 0x1c3   : > { %v784_v54 = vadd.f32 %v2119_v24, %v3278_v10  ;;  %v2154_v10 = vsel %vm963_vm4, 1.0, %v2490_v63 }
 0x1c5   : > { %v1150_v15 = vpop.permute.xlu1 %1149 }
 0x1c6   : > { %vm1180_vm7 = vcmp.eq.s32.totalorder %v2787_v60, %v1150_v15  ;;  %v1171_v15 = vpop.permute.xlu0 %1170 }
 0x1c7   : > { %v2179_v55 = vsel %vm1180_vm7, 1.0, %v2490_v63 }
 0x1c8   : > { %v1228_v26 = vadd.f32 %v2179_v55, %v1116_v44 }
 0x1c9   : > { %v1153_v22 = vpop.permute.xlu1 %1152 }
 0x1ca   : > { %vm1181_vm9 = vcmp.eq.s32.totalorder %v2787_v60, %v1153_v22 }
 0x1cb   : > { %v2180_v40 = vsel %vm1181_vm9, 1.0, %v2490_v63  ;;  %vm1073_vm9 = vcmp.eq.s32.totalorder %v2787_v60, %v3295_v17  ;;  %v2183_v17 = vsel %vm1184_vm11, 1.0, %v2490_v63 }
 0x1cc   : > { %v1229_v6 = vadd.f32 %v2180_v40, %v1117_v30  ;;  %v2168_v25 = vsel %vm1073_vm9, 1.0, %v2490_v63 }
 0x1ce   : > { %v723_v52 = vpop.permute.xlu1 %722  ;;  %v1240_v23 = vpack.c.bf16 %v1229_v6, %v1228_v26 }
 0x1cf   : > { %vm739_vm3 = vcmp.eq.s32.totalorder %v2787_v60, %v723_v52 }
 0x1d0   : > { %2280 = vmatprep.mubr.bf16.mxu0 %v1240_v23  ;;  %v2122_v33 = vsel %vm739_vm3, 1.0, %v2490_v63 }
 0x1d1   : > { %v787_v28 = vadd.f32 %v2122_v33, %v675_v57 }
 0x1d3   : > { %v1159_v38 = vpop.permute.xlu1 %1158 }
 0x1d4   : > { %vm1183_vm15 = vcmp.eq.s32.totalorder %v2787_v60, %v1159_v38 }
 0x1d5   : > { %v2182_v11 = vsel %vm1183_vm15, 1.0, %v2490_v63  ;;  %vm1187_vm15 = vcmp.eq.s32.totalorder %v2787_v60, %v1171_v15 }
 0x1d6   : > { %v1231_v29 = vadd.f32 %v2182_v11, %v1119_v20 }
 0x1d8   : > { %v826_v39 = vpop.permute.xlu1 %825  ;;  %v1241_v18 = vpack.c.bf16 %v1231_v29, %v1230_v36 }
 0x1d9   : > { %vm848_vm2 = vcmp.eq.s32.totalorder %v2787_v60, %v826_v39 }
 0x1da   : > { %v2135_v27 = vsel %vm848_vm2, 1.0, %v2490_v63  ;;  %2281 = vmatmul.mubr.bf16.gmra.mrb[8].mxu0 %v1241_v18 }
 0x1db   : > { %v896_v35 = vadd.f32 %v2135_v27, %v784_v54 }
 0x1dc   : > { %v832_v8 = vpop.permute.xlu1 %831 }
 0x1dd   : > { %v1008_v21 = vadd.f32 %v2151_v50, %v896_v35  ;;  %vm850_vm8 = vcmp.eq.s32.totalorder %v2787_v60, %v832_v8 }
 0x1de   : > { %v2137_v59 = vsel %vm850_vm8, 1.0, %v2490_v63 }
 0x1df   : > { %v898_v14 = vadd.f32 %v2137_v59, %v2996_v53  ;;  %v2186_v53 = vsel %vm1187_vm15, 1.0, %v2490_v63 }
 0x1e0   : > { %v835_v1 = vpop.permute.xlu1 %834 }
 0x1e1   : > { %vm851_vm5 = vcmp.eq.s32.totalorder %v2787_v60, %v835_v1 }
 0x1e2   : > { %v2138_v7 = vsel %vm851_vm5, 1.0, %v2490_v63 }
 0x1e3   : > { %v899_v13 = vadd.f32 %v2138_v7, %v787_v28 }
 0x1e5   : > { %v941_v43 = vpop.permute.xlu1 %940  ;;  %v1011_v12 = vadd.f32 %v2154_v10, %v899_v13 }
 0x1e6   : > { %vm961_vm6 = vcmp.eq.s32.totalorder %v2787_v60, %v941_v43 }
 0x1e7   : > { %v2152_v45 = vsel %vm961_vm6, 1.0, %v2490_v63 }
 0x1e8   : > { %v1009_v5 = vadd.f32 %v2152_v45, %v3021_v46 }
 0x1e9   : > { %v944_v16 = vpop.permute.xlu1 %943 }
 0x1ea   : > { %vm962_vm10 = vcmp.eq.s32.totalorder %v2787_v60, %v944_v16  ;;  %v1121_v19 = vadd.f32 %v2168_v25, %v1009_v5 }
 0x1eb   : > { %v2153_v62 = vsel %vm962_vm10, 1.0, %v2490_v63 }
 0x1ec   : > { %v1010_v22 = vadd.f32 %v2153_v62, %v898_v14 }
 0x1ee   : > { %v1050_v4 = vpop.permute.xlu1 %1049 }
 0x1ef   : > { %vm1072_vm7 = vcmp.eq.s32.totalorder %v2787_v60, %v1050_v4 }
 0x1f0   : > { %v2167_v37 = vsel %vm1072_vm7, 1.0, %v2490_v63 }
 0x1f1   : > { %v1120_v34 = vadd.f32 %v2167_v37, %v1008_v21 }
 0x1f2   : > { %v1056_v31 = vpop.permute.xlu1 %1055 }
 0x1f3   : > { %vm1074_vm13 = vcmp.eq.s32.totalorder %v2787_v60, %v1056_v31  ;;  %v1232_v44 = vadd.f32 %v2183_v17, %v1120_v34 }
 0x1f4   : > { %v2169_v58 = vsel %vm1074_vm13, 1.0, %v2490_v63 }
 0x1f5   : > { %v1122_v6 = vadd.f32 %v2169_v58, %v1010_v22  ;;  %v2439_v22 = vld [vmem:[%s3524_s4] sm:$0xff]  }
 0x1f6   : > { %v1059_v47 = vpop.permute.xlu1 %1058  ;;  %2320 = vmatprep.subr.bf16.mxu0 %v2439_v22  ;;  %2338 = vmatprep.subr.bf16.mxu1 %v2439_v22 }
 0x1f7   : > { %vm1075_vm12 = vcmp.eq.s32.totalorder %v2787_v60, %v1059_v47  ;;  %2321 = vmatpush3.bf16.msra.mxu0 %v2439_v22 }
 0x1f8   : > { %v2170_v46 = vsel %vm1075_vm12, 1.0, %v2490_v63 }
 0x1f9   : > { %v1123_v30 = vadd.f32 %v2170_v46, %v1011_v12 }
 0x1fb   : > { %v1165_v9 = vpop.permute.xlu1 %1164  ;;  %v1235_v52 = vadd.f32 %v2186_v53, %v1123_v30 }
 0x1fc   : > { %vm1185_vm14 = vcmp.eq.s32.totalorder %v2787_v60, %v1165_v9 }
 0x1fd   : > { %v2184_v55 = vsel %vm1185_vm14, 1.0, %v2490_v63 }
 0x1fe   : > { %v1233_v40 = vadd.f32 %v2184_v55, %v1121_v19 }
 0x1ff   : > { %v1168_v26 = vpop.permute.xlu1 %1167 }
 0x200   : > { %vm1186_vm0 = vcmp.eq.s32.totalorder %v2787_v60, %v1168_v26  ;;  %v1242_v41 = vpack.c.bf16 %v1233_v40, %v1232_v44 }
 0x201   : > { %v2185_v42 = vsel %vm1186_vm0, 1.0, %v2490_v63 }
 0x202   : > { %v1234_v23 = vadd.f32 %v2185_v42, %v1122_v6  ;;  %2284 = vmatprep.mubr.bf16.mxu0 %v1242_v41 }
 0x204   : > { %v1243_v2 = vpack.c.bf16 %v1235_v52, %v1234_v23 }
 0x206   : > { %2285 = vmatmul.mubr.bf16.gmra.mrb[12].mxu0 %v1243_v2 }
 0x21b   : > { %v2274_v56 = vpop.f32.mrb[0].mxu0 }
 0x21c   : > { %v1342_v3 = vpop.f32.mrb[1].mxu0  ;;  %v1407_v49 = vmax.f32 %v2274_v56, 0.0 }
 0x21d   : > { %v2275_v48 = vpop.f32.mrb[2].mxu0  ;;  %v1405_v51 = vmax.f32 %v1342_v3, 0.0 }
 0x21e   : > { %v1408_v0 = vmax.f32 %v2275_v48, 0.0  ;;  %v1345_v38 = vpop.f32.mrb[3].mxu0 }
 0x21f   : > { %v1406_v20 = vmax.f32 %v1345_v38, 0.0  ;;  %v1625_v38 = vld [vmem:[%s3406_s29 + $0x18] sm:$0xff] }
 0x220   : > { %v1422_v11 = vpack.c.bf16 %v1408_v0, %v1407_v49  ;;  %v1624_v49 = vld [vmem:[%s3406_s29 + $0x10] sm:$0xff] }
 0x221   : > { %v1421_v60 = vpack.c.bf16 %v1406_v20, %v1405_v51 }
 0x223   : > { %2304 = vmatprep.mubr.bf16.mxu1 %v1421_v60 }
 0x224   : > { %2305 = vmatmul.mubr.bf16.vlgmr.msra.gmra.mrb[0].mxu1 %v1422_v11  ;;  %v1622_v11 = vld [vmem:[%s3406_s29] sm:$0xff] }
 0x225   : > { %2339 = vmatpush3.bf16.msra.mxu1 %v2439_v22 }
 0x24d   : > { %v2278_v36 = vpop.f32.mrb[4].mxu0 }
 0x24e   : > { %v1358_v24 = vpop.f32.mrb[5].mxu0  ;;  %v1411_v29 = vmax.f32 %v2278_v36, 0.0 }
 0x24f   : > { %v2279_v63 = vpop.f32.mrb[6].mxu0  ;;  %v1409_v54 = vmax.f32 %v1358_v24, 0.0  ;;  %v1623_v24 = vld [vmem:[%s3406_s29 + $0x8] sm:$0xff] }
 0x250   : > { %v1412_v39 = vmax.f32 %v2279_v63, 0.0  ;;  %v1361_v18 = vpop.f32.mrb[7].mxu0 }
 0x251   : > { %v1410_v27 = vmax.f32 %v1361_v18, 0.0 }
 0x252   : > { %v1424_v35 = vpack.c.bf16 %v1412_v39, %v1411_v29 }
 0x253   : > { %v1423_v50 = vpack.c.bf16 %v1410_v27, %v1409_v54 }
 0x255   : > { %2308 = vmatprep.mubr.bf16.mxu1 %v1423_v50 }
 0x256   : > { %2309 = vmatmul.mubr.bf16.gmra.mrb[4].mxu1 %v1424_v35 }
 0x2ad   : > { %v2282_v61 = vpop.f32.mrb[8].mxu0 }
 0x2ae   : > { %v1374_v8 = vpop.f32.mrb[9].mxu0  ;;  %v1415_v33 = vmax.f32 %v2282_v61, 0.0 }
 0x2af   : > { %v2283_v21 = vpop.f32.mrb[10].mxu0  ;;  %v1413_v28 = vmax.f32 %v1374_v8, 0.0 }
 0x2b0   : > { %v1416_v57 = vmax.f32 %v2283_v21, 0.0  ;;  %v1377_v1 = vpop.f32.mrb[11].mxu0 }
 0x2b1   : > { %v1414_v7 = vmax.f32 %v1377_v1, 0.0 }
 0x2b2   : > { %v1426_v13 = vpack.c.bf16 %v1416_v57, %v1415_v33 }
 0x2b3   : > { %v1425_v10 = vpack.c.bf16 %v1414_v7, %v1413_v28 }
 0x2b5   : > { %2312 = vmatprep.mubr.bf16.mxu1 %v1425_v10 }
 0x2b6   : > { %2313 = vmatmul.mubr.bf16.gmra.mrb[8].mxu1 %v1426_v13 }
 0x2d9   : > { %v2286_v43 = vpop.f32.mrb[12].mxu0 }
 0x2da   : > { %v1390_v12 = vpop.f32.mrb[13].mxu0  ;;  %v1419_v4 = vmax.f32 %v2286_v43, 0.0 }
 0x2db   : > { %v2287_v16 = vpop.f32.mrb[14].mxu0  ;;  %v1417_v45 = vmax.f32 %v1390_v12, 0.0 }
 0x2dc   : > { %v1420_v31 = vmax.f32 %v2287_v16, 0.0  ;;  %v1393_v32 = vpop.f32.mrb[15].mxu0 }
 0x2dd   : > { %v1418_v47 = vmax.f32 %v1393_v32, 0.0 }
 0x2de   : > { %v1428_v37 = vpack.c.bf16 %v1420_v31, %v1419_v4 }
 0x2df   : > { %v1427_v5 = vpack.c.bf16 %v1418_v47, %v1417_v45 }
 0x2e1   : > { %2316 = vmatprep.mubr.bf16.mxu1 %v1427_v5 }
 0x2e2   : > { %2317 = vmatmul.mubr.bf16.gmra.mrb[12].mxu1 %v1428_v37 }
 0x2f7   : > { %v2306_v59 = vpop.f32.mrb[0].mxu1 }
 0x2f8   : > { %1592 = vst [vmem:[%s3365_s21 + $0x10] sm:$0xff] %v2306_v59  ;;  %v1640_v34 = vmul.f32 0.5, %v2306_v59  ;;  %v3368_v15 = vpop.f32.mrb[1].mxu1 }
 0x2f9   : > { %1590 = vst [vmem:[%s3365_s21] sm:$0xff] %v3368_v15  ;;  %v1638_v25 = vmul.f32 0.5, %v3368_v15  ;;  %v2307_v62 = vpop.f32.mrb[2].mxu1 }
 0x2fa   : > { %v1658_v17 = vmul.f32 1.442695, %v1640_v34  ;;  %1593 = vst [vmem:[%s3365_s21 + $0x18] sm:$0xff] %v2307_v62  ;;  %v1641_v46 = vmul.f32 0.5, %v2307_v62  ;;  %v1530_v9 = vpop.f32.mrb[3].mxu1 }
 0x2fb   : > { %1591 = vst [vmem:[%s3365_s21 + $0x8] sm:$0xff] %v1530_v9  ;;  %v1639_v14 = vmul.f32 0.5, %v1530_v9  ;;  %v1654_v19 = vmul.f32 1.442695, %v1638_v25  ;;  %v1626_v25 = vld [vmem:[%s3406_s29 + $0x20] sm:$0xff] }
 0x2fc   : > { %2440 = vpow2.f32 %v1658_v17  ;;  %v1660_v58 = vmul.f32 1.442695, %v1641_v46  ;;  %v1627_v17 = vld [vmem:[%s3406_s29 + $0x28] sm:$0xff] }
 0x2fd   : > { %v1656_v55 = vmul.f32 1.442695, %v1639_v14 }
 0x2fe   : > { %2442 = vpow2.f32 %v1660_v58 }
 0x2ff   : > { %2444 = vpow2.f32 %v1654_v19 }
 0x300   : > { %2446 = vpow2.f32 %v1656_v55 }
 0x306   : > { %v2441_v44 = vpop.eup %2440 }
 0x307   : > { %1706 = vrot.lane.b32.xlu1 %v2441_v44, %s2491_s25 }
 0x308   : > { %v2443_v30 = vpop.eup %2442 }
 0x309   : > { %1708 = vrot.lane.b32.xlu0 %v2443_v30, %s2491_s25  ;;  %v2445_v40 = vpop.eup %2444 }
 0x30a   : > { %v2447_v26 = vpop.eup %2446 }
 0x30b   : > { %1702 = vrot.lane.b32.xlu1 %v2445_v40, %s2491_s25 }
 0x30d   : > { %1704 = vrot.lane.b32.xlu0 %v2447_v26, %s2491_s25 }
 0x329   : > { %v3382_v6 = vpop.f32.mrb[4].mxu1 }
 0x32a   : > { %1596 = vst [vmem:[%s3365_s21 + $0x30] sm:$0xff] %v3382_v6  ;;  %v3386_v41 = vpop.f32.mrb[5].mxu1  ;;  %v1644_v43 = vmul.f32 0.5, %v3382_v6 }
 0x32b   : > { %1594 = vst [vmem:[%s3365_s21 + $0x20] sm:$0xff] %v3386_v41  ;;  %v1642_v53 = vmul.f32 0.5, %v3386_v41  ;;  %v3391_v42 = vpop.f32.mrb[6].mxu1 }
 0x32c   : > { %1597 = vst [vmem:[%s3365_s21 + $0x38] sm:$0xff] %v3391_v42  ;;  %v3395_v52 = vpop.f32.mrb[7].mxu1  ;;  %v1645_v4 = vmul.f32 0.5, %v3391_v42  ;;  %v1666_v32 = vmul.f32 1.442695, %v1644_v43 }
 0x32d   : > { %v1662_v23 = vmul.f32 1.442695, %v1642_v53  ;;  %1595 = vst [vmem:[%s3365_s21 + $0x28] sm:$0xff] %v3395_v52  ;;  %v1643_v2 = vmul.f32 0.5, %v3395_v52 }
 0x32e   : > { %v1668_v45 = vmul.f32 1.442695, %v1645_v4 }
 0x32f   : > { %2448 = vpow2.f32 %v1662_v23  ;;  %v1664_v56 = vmul.f32 1.442695, %v1643_v2 }
 0x331   : > { %2450 = vpow2.f32 %v1664_v56 }
 0x339   : > { %v2449_v3 = vpop.eup %2448 }
 0x33a   : > { %1710 = vrot.lane.b32.xlu1 %v2449_v3, %s2491_s25 }
 0x33b   : > { %v2451_v48 = vpop.eup %2450 }
 0x33c   : > { %1712 = vrot.lane.b32.xlu0 %v2451_v48, %s2491_s25 }
 0x379   : > { %v1707_v0 = vpop.permute.xlu1 %1706 }
 0x37a   : > { %v1752_v51 = vmul.f32 %v1707_v0, %v1624_v49 }
 0x37b   : > { %v1709_v20 = vpop.permute.xlu0 %1708 }
 0x37c   : > { %v1753_v60 = vmul.f32 %v1709_v20, %v1625_v38  ;;  %v1768_v63 = vadd.f32 %v2306_v59, %v1752_v51  ;;  %v1632_v51 = vld [vmem:[%s3406_s29 + $0x50] sm:$0xff] }
 0x37d   : > { %v1703_v36 = vpop.permute.xlu1 %1702 }
 0x37e   : > { %v1769_v29 = vadd.f32 %v2307_v62, %v1753_v60  ;;  %v1750_v39 = vmul.f32 %v1703_v36, %v1622_v11  ;;  %v1633_v11 = vld [vmem:[%s3406_s29 + $0x58] sm:$0xff] }
 0x37f   : > { %v1705_v18 = vpop.permute.xlu0 %1704 }
 0x380   : > { %v1783_v54 = vpack.c.bf16 %v1769_v29, %v1768_v63  ;;  %v1751_v27 = vmul.f32 %v1705_v18, %v1623_v24  ;;  %v1766_v35 = vadd.f32 %v1750_v39, %v3368_v15  ;;  %v1630_v24 = vld [vmem:[%s3406_s29 + $0x40] sm:$0xff]  ;;  %v1631_v39 = vld [vmem:[%s3406_s29 + $0x48] sm:$0xff] }
 0x382   : > { %v1767_v50 = vadd.f32 %v1751_v27, %v1530_v9 }
 0x384   : > { %v1782_v61 = vpack.c.bf16 %v1767_v50, %v1766_v35  ;;  %v1628_v50 = vld [vmem:[%s3406_s29 + $0x30] sm:$0xff] }
 0x386   : > { %2322 = vmatprep.mubr.msk.bf16.mxu0 %vm1805_vm1, %v1782_v61 }
 0x387   : > { %2323 = vmatmul.mubr.msk.bf16.vlgmr.msra.gmra.mrb[16].mxu0 %vm1805_vm1, %v1783_v54 }
 0x389   : > { %v3415_v8 = vpop.f32.mrb[8].mxu1 }
 0x38a   : > { %1600 = vst [vmem:[%s3365_s21 + $0x50] sm:$0xff] %v3415_v8  ;;  %v1648_v21 = vmul.f32 0.5, %v3415_v8  ;;  %v3420_v33 = vpop.f32.mrb[9].mxu1 }
 0x38b   : > { %1598 = vst [vmem:[%s3365_s21 + $0x40] sm:$0xff] %v3420_v33  ;;  %v1646_v57 = vmul.f32 0.5, %v3420_v33  ;;  %v3425_v1 = vpop.f32.mrb[10].mxu1 }
 0x38c   : > { %v1674_v28 = vmul.f32 1.442695, %v1648_v21  ;;  %1601 = vst [vmem:[%s3365_s21 + $0x58] sm:$0xff] %v3425_v1  ;;  %v1649_v7 = vmul.f32 0.5, %v3425_v1  ;;  %v3430_v13 = vpop.f32.mrb[11].mxu1 }
 0x38d   : > { %1599 = vst [vmem:[%s3365_s21 + $0x48] sm:$0xff] %v3430_v13  ;;  %v1647_v10 = vmul.f32 0.5, %v3430_v13  ;;  %v1670_v12 = vmul.f32 1.442695, %v1646_v57 }
 0x38e   : > { %2452 = vpow2.f32 %v1674_v28  ;;  %v1676_v16 = vmul.f32 1.442695, %v1649_v7  ;;  %v1629_v28 = vld [vmem:[%s3406_s29 + $0x38] sm:$0xff] }
 0x38f   : > { %v1672_v31 = vmul.f32 1.442695, %v1647_v10 }
 0x390   : > { %2454 = vpow2.f32 %v1676_v16 }
 0x391   : > { %2456 = vpow2.f32 %v1670_v12 }
 0x392   : > { %2458 = vpow2.f32 %v1672_v31 }
 0x393   : > { %2460 = vpow2.f32 %v1666_v32 }
 0x394   : > { %2462 = vpow2.f32 %v1668_v45 }
 0x398   : > { %v2453_v47 = vpop.eup %2452 }
 0x399   : > { %1722 = vrot.lane.b32.xlu1 %v2453_v47, %s2491_s25 }
 0x39a   : > { %v2455_v37 = vpop.eup %2454 }
 0x39b   : > { %1724 = vrot.lane.b32.xlu0 %v2455_v37, %s2491_s25  ;;  %v2457_v5 = vpop.eup %2456  ;;  %v1636_v37 = vld [vmem:[%s3406_s29 + $0x70] sm:$0xff] }
 0x39c   : > { %v2459_v59 = vpop.eup %2458 }
 0x39d   : > { %1718 = vrot.lane.b32.xlu1 %v2457_v5, %s2491_s25  ;;  %v2461_v34 = vpop.eup %2460 }
 0x39e   : > { %v2463_v15 = vpop.eup %2462 }
 0x39f   : > { %1720 = vrot.lane.b32.xlu0 %v2459_v59, %s2491_s25 }
 0x3a1   : > { %1714 = vrot.lane.b32.xlu1 %v2461_v34, %s2491_s25  ;;  %v1637_v34 = vld [vmem:[%s3406_s29 + $0x78] sm:$0xff] }
 0x3a3   : > { %1716 = vrot.lane.b32.xlu0 %v2463_v15, %s2491_s25 }
 0x3ac   : > { %v1711_v62 = vpop.permute.xlu1 %1710 }
 0x3ad   : > { %v1754_v46 = vmul.f32 %v1711_v62, %v1626_v25 }
 0x3ae   : > { %v1713_v9 = vpop.permute.xlu0 %1712 }
 0x3af   : > { %v1755_v14 = vmul.f32 %v1713_v9, %v1627_v17  ;;  %v1770_v19 = vadd.f32 %v1754_v46, %v3386_v41 }
 0x3b1   : > { %v1771_v58 = vadd.f32 %v1755_v14, %v3395_v52 }
 0x3b3   : > { %v1784_v55 = vpack.c.bf16 %v1771_v58, %v1770_v19  ;;  %v2203_v19 = vld [vmem:[%s3525_s5] ss:$0 sm:$0xff] }
 0x3b5   : > { %v3447_v22 = vpop.f32.mrb[12].mxu1  ;;  %2326 = vmatprep.mubr.msk.bf16.mxu0 %vm1805_vm1, %v1784_v55 }
 0x3b6   : > { %1604 = vst [vmem:[%s3365_s21 + $0x70] sm:$0xff] %v3447_v22  ;;  %v3452_v44 = vpop.f32.mrb[13].mxu1  ;;  %v1652_v30 = vmul.f32 0.5, %v3447_v22 }
 0x3b7   : > { %1602 = vst [vmem:[%s3365_s21 + $0x60] sm:$0xff] %v3452_v44  ;;  %v1650_v40 = vmul.f32 0.5, %v3452_v44  ;;  %v3458_v26 = vpop.f32.mrb[14].mxu1 }
 0x3b8   : > { %1605 = vst [vmem:[%s3365_s21 + $0x78] sm:$0xff] %v3458_v26  ;;  %v1578_v41 = vpop.f32.mrb[15].mxu1  ;;  %v1653_v52 = vmul.f32 0.5, %v3458_v26  ;;  %v1682_v2 = vmul.f32 1.442695, %v1652_v30 }
 0x3b9   : > { %v1678_v53 = vmul.f32 1.442695, %v1650_v40  ;;  %1603 = vst [vmem:[%s3365_s21 + $0x68] sm:$0xff] %v1578_v41  ;;  %v1651_v23 = vmul.f32 0.5, %v1578_v41 }
 0x3ba   : > { %v1684_v3 = vmul.f32 1.442695, %v1653_v52 }
 0x3bb   : > { %2464 = vpow2.f32 %v1678_v53  ;;  %v1680_v56 = vmul.f32 1.442695, %v1651_v23 }
 0x3bd   : > { %2466 = vpow2.f32 %v1680_v56 }
 0x3be   : > { %2468 = vpow2.f32 %v1682_v2 }
 0x3bf   : > { %2470 = vpow2.f32 %v1684_v3 }
 0x3c5   : > { %v2465_v48 = vpop.eup %2464 }
 0x3c6   : > { %1726 = vrot.lane.b32.xlu1 %v2465_v48, %s2491_s25 }
 0x3c7   : > { %v2467_v49 = vpop.eup %2466 }
 0x3c8   : > { %1728 = vrot.lane.b32.xlu0 %v2467_v49, %s2491_s25  ;;  %v2469_v0 = vpop.eup %2468 }
 0x3c9   : > { %v2471_v38 = vpop.eup %2470 }
 0x3ca   : > { %1730 = vrot.lane.b32.xlu1 %v2469_v0, %s2491_s25 }
 0x3cc   : > { %1732 = vrot.lane.b32.xlu0 %v2471_v38, %s2491_s25 }
 0x40b   : > { %v1723_v20 = vpop.permute.xlu1 %1722 }
 0x40c   : > { %v1760_v60 = vmul.f32 %v1723_v20, %v1632_v51 }
 0x40d   : > { %v1725_v36 = vpop.permute.xlu0 %1724 }
 0x40e   : > { %v1761_v63 = vmul.f32 %v1725_v36, %v1633_v11  ;;  %v1776_v18 = vadd.f32 %v3415_v8, %v1760_v60 }
 0x40f   : > { %v1719_v29 = vpop.permute.xlu1 %1718 }
 0x410   : > { %v1777_v54 = vadd.f32 %v3425_v1, %v1761_v63  ;;  %v1758_v27 = vmul.f32 %v1719_v29, %v1630_v24 }
 0x411   : > { %v1721_v35 = vpop.permute.xlu0 %1720 }
 0x412   : > { %v1787_v61 = vpack.c.bf16 %v1777_v54, %v1776_v18  ;;  %v1759_v21 = vmul.f32 %v1721_v35, %v1631_v39  ;;  %v1774_v7 = vadd.f32 %v1758_v27, %v3420_v33  ;;  %v1634_v33 = vld [vmem:[%s3406_s29 + $0x60] sm:$0xff] }
 0x413   : > { %v1715_v57 = vpop.permute.xlu1 %1714 }
 0x414   : > { %v1775_v10 = vadd.f32 %v1759_v21, %v3430_v13  ;;  %v1756_v43 = vmul.f32 %v1715_v57, %v1628_v50  ;;  %v1635_v13 = vld [vmem:[%s3406_s29 + $0x68] sm:$0xff] }
 0x415   : > { %v1717_v12 = vpop.permute.xlu0 %1716 }
 0x416   : > { %v1786_v16 = vpack.c.bf16 %v1775_v10, %v1774_v7  ;;  %v1757_v8 = vmul.f32 %v1717_v12, %v1629_v28  ;;  %v1772_v1 = vadd.f32 %v3382_v6, %v1756_v43 }
 0x418   : > { %v1773_v4 = vadd.f32 %v3391_v42, %v1757_v8  ;;  %2330 = vmatprep.mubr.msk.bf16.mxu1 %vm1805_vm1, %v1786_v16 }
 0x419   : > { %2331 = vmatmul.mubr.msk.bf16.vlgmr.msra.gmra.mrb[16].mxu1 %vm1805_vm1, %v1787_v61 }
 0x41a   : > { %v1785_v31 = vpack.c.bf16 %v1773_v4, %v1772_v1 }
 0x41c   : > { %2327 = vmatmul.mubr.msk.bf16.gmra.mrb[20].mxu0 %vm1805_vm1, %v1785_v31 }
 0x438   : > { %v1727_v32 = vpop.permute.xlu1 %1726 }
 0x439   : > { %v1762_v45 = vmul.f32 %v1727_v32, %v1634_v33 }
 0x43a   : > { %v1729_v47 = vpop.permute.xlu0 %1728 }
 0x43b   : > { %v1763_v5 = vmul.f32 %v1729_v47, %v1635_v13  ;;  %v1778_v6 = vadd.f32 %v1762_v45, %v3452_v44 }
 0x43c   : > { %v1731_v59 = vpop.permute.xlu1 %1730 }
 0x43d   : > { %v1779_v42 = vadd.f32 %v1763_v5, %v1578_v41  ;;  %v1764_v15 = vmul.f32 %v1731_v59, %v1636_v37 }
 0x43e   : > { %v1733_v25 = vpop.permute.xlu0 %1732 }
 0x43f   : > { %v1788_v62 = vpack.c.bf16 %v1779_v42, %v1778_v6  ;;  %v1765_v17 = vmul.f32 %v1733_v25, %v1637_v34  ;;  %v1780_v46 = vadd.f32 %v3447_v22, %v1764_v15 }
 0x441   : > { %v1781_v9 = vadd.f32 %v3458_v26, %v1765_v17  ;;  %2334 = vmatprep.mubr.msk.bf16.mxu1 %vm1805_vm1, %v1788_v62 }
 0x443   : > { %v1789_v14 = vpack.c.bf16 %v1781_v9, %v1780_v46 }
 0x445   : > { %2335 = vmatmul.mubr.msk.bf16.gmra.mrb[20].mxu1 %vm1805_vm1, %v1789_v14 }
 0x45a   : > { %v2324_v58 = vpop.f32.mrb[16].mxu0 }
 0x45b   : > { %v1873_v55 = vadd.f32 %v2324_v58, %v2203_v19  ;;  %v1864_v22 = vpop.f32.mrb[17].mxu0 }
 0x45c   : > { %v1865_v44 = vadd.f32 %v2203_v19, %v1864_v22  ;;  %v2325_v30 = vpop.f32.mrb[18].mxu0 }
 0x45d   : > { %1929 = vst [vmem:[%s3499_s11 + $0x10] sm:$0xff] %v1873_v55  ;;  %v1876_v40 = vadd.f32 %v2325_v30, %v2203_v19  ;;  %v1867_v26 = vpop.f32.mrb[19].mxu0 }
 0x45e   : > { %1927 = vst [vmem:[%s3499_s11] sm:$0xff] %v1865_v44  ;;  %v1868_v41 = vadd.f32 %v2203_v19, %v1867_v26 }
 0x45f   : > { %1930 = vst [vmem:[%s3499_s11 + $0x18] sm:$0xff] %v1876_v40 }
 0x460   : > { %1928 = vst [vmem:[%s3499_s11 + $0x8] sm:$0xff] %v1868_v41 }
 0x4ec   : > { %v2332_v53 = vpop.f32.mrb[16].mxu1 }
 0x4ed   : > { %v1905_v52 = vadd.f32 %v2332_v53, %v2203_v19  ;;  %v1896_v23 = vpop.f32.mrb[17].mxu1 }
 0x4ee   : > { %v1897_v2 = vadd.f32 %v2203_v19, %v1896_v23  ;;  %v2333_v56 = vpop.f32.mrb[18].mxu1 }
 0x4ef   : > { %1937 = vst [vmem:[%s3499_s11 + $0x50] sm:$0xff] %v1905_v52  ;;  %v1908_v3 = vadd.f32 %v2333_v56, %v2203_v19  ;;  %v2328_v48 = vpop.f32.mrb[20].mxu0  ;;  %v1899_v49 = vpop.f32.mrb[19].mxu1 }
 0x4f0   : > { %1935 = vst [vmem:[%s3499_s11 + $0x40] sm:$0xff] %v1897_v2  ;;  %v1889_v0 = vadd.f32 %v2328_v48, %v2203_v19  ;;  %v1900_v38 = vadd.f32 %v2203_v19, %v1899_v49  ;;  %v1880_v51 = vpop.f32.mrb[21].mxu0 }
 0x4f1   : > { %1938 = vst [vmem:[%s3499_s11 + $0x58] sm:$0xff] %v1908_v3  ;;  %v1881_v20 = vadd.f32 %v2203_v19, %v1880_v51  ;;  %v2329_v11 = vpop.f32.mrb[22].mxu0 }
 0x4f2   : > { %1933 = vst [vmem:[%s3499_s11 + $0x30] sm:$0xff] %v1889_v0  ;;  %1936 = vst [vmem:[%s3499_s11 + $0x48] sm:$0xff] %v1900_v38  ;;  %v1892_v60 = vadd.f32 %v2329_v11, %v2203_v19  ;;  %v1883_v36 = vpop.f32.mrb[23].mxu0 }
 0x4f3   : > { %1931 = vst [vmem:[%s3499_s11 + $0x20] sm:$0xff] %v1881_v20  ;;  %v1884_v24 = vadd.f32 %v2203_v19, %v1883_v36 }
 0x4f4   : > { %1934 = vst [vmem:[%s3499_s11 + $0x38] sm:$0xff] %v1892_v60 }
 0x4f5   : > { %1932 = vst [vmem:[%s3499_s11 + $0x28] sm:$0xff] %v1884_v24 }
 0x518   : > { %v2336_v63 = vpop.f32.mrb[20].mxu1 }
 0x519   : > { %v1921_v29 = vadd.f32 %v2336_v63, %v2203_v19  ;;  %v1912_v39 = vpop.f32.mrb[21].mxu1 }
 0x51a   : > { %v1913_v18 = vadd.f32 %v2203_v19, %v1912_v39  ;;  %v2337_v54 = vpop.f32.mrb[22].mxu1 }
 0x51b   : > { %1941 = vst [vmem:[%s3499_s11 + $0x70] sm:$0xff] %v1921_v29  ;;  %v1924_v27 = vadd.f32 %v2337_v54, %v2203_v19  ;;  %v1915_v35 = vpop.f32.mrb[23].mxu1 }
 0x51c   : > { %1939 = vst [vmem:[%s3499_s11 + $0x60] sm:$0xff] %v1913_v18  ;;  %v1916_v50 = vadd.f32 %v2203_v19, %v1915_v35 }
 0x51d   : > { %1942 = vst [vmem:[%s3499_s11 + $0x78] sm:$0xff] %v1924_v27 }
 0x51e   : > { %1940 = vst [vmem:[%s3499_s11 + $0x68] sm:$0xff] %v1916_v50 }
 0x51f PF: > { %s18_s24 = sadd.s32 1, %s2480_s24  }
 0x520   : > { %p15_p4 = scmp.ge.s32.totalorder %s18_s24, 4  }
 0x522   :  { %17 = sbr.rel (!%p15_p4) target bundleno = 1 (0x1), region = 89 }

</bundles_post_ra>
